<compile_context>
chip_gen: v6e
topology: v6e:2x2x1
jax: 0.10.0
libtpu: 0.0.40
codegen_flags: <defaults>
</compile_context>

<pallas_src>
import math

import jax
import jax.numpy as jnp
import numpy as np
from jax import lax
from jax.experimental import pallas as pl
from jax.experimental.pallas import tpu as pltpu

# ---------------- problem configuration (small, consistent with the module) -------------
B = 2                # batch
N_JOINTS = 4         # num_joints
NP1 = N_JOINTS + 1   # joints + cls token (spatial attention runs over N+1 tokens)
D_IN = 16            # per-joint input feature size (d_in)
D_MODEL = 32         # d_model
NUM_HEADS = 4        # num_heads_spacial
DEPTH = D_MODEL // NUM_HEADS
NUM_LAYERS = 2       # num_layers
LN_EPS = 1e-5        # torch LayerNorm default eps


# ---------------- Pallas kernel: whole forward pass in one invocation --------------------
def _spatial_transformer_kernel(xf_ref, sel_ref, wemb_ref, bembf_ref,
                                wq_ref, bqf_ref, wkv_ref, bkv_ref,
                                wo_ref, bo_ref, gam_ref, bet_ref, out_ref):
    m = xf_ref.shape[0]                  # B * (N+1) rows
    bsz = m // NP1
    scale = 1.0 / math.sqrt(DEPTH)

    xf = xf_ref[...]                     # (M, D_IN)
    sel = sel_ref[...]                   # (M, NP1): sel[r, t] = 1 iff row r is token t

    # ---- joint embeddings + cls token ----
    # cls rows get only the bias (== cls_token); joint rows get x @ W_j + b_j, selected by
    # a per-row one-hot column. 4 tiny MXU pushes, no block-diagonal 160-lane intermediate.
    tokens = bembf_ref[...]              # (M, D_MODEL): cls_token / b_embed rows
    for j in range(N_JOINTS):            # static unroll
        tokens = tokens + sel[:, j + 1:j + 2] * jnp.dot(
            xf, wemb_ref[j], preferred_element_type=jnp.float32)

    for l in range(NUM_LAYERS):          # static unroll
        # ---- shared K | V: one plain (M, D) @ (D, 2D) matmul, off the select path ----
        kv = jnp.dot(tokens, wkv_ref[l], preferred_element_type=jnp.float32) + bkv_ref[l]
        k = kv[:, 0:D_MODEL]
        v = kv[:, D_MODEL:2 * D_MODEL]

        # ---- per-token Q: NP1 statically-unrolled (M, D)@(D, D) matmuls + row select ----
        q = bqf_ref[l]                   # per-token bias (already row-tiled)
        for t in range(NP1):
            q = q + sel[:, t:t + 1] * jnp.dot(
                tokens, wq_ref[l, t], preferred_element_type=jnp.float32)

        # leading-dim-only reshapes (layout preserving)
        q3 = q.reshape(bsz, NP1, D_MODEL)
        k3 = k.reshape(bsz, NP1, D_MODEL)
        v3 = v.reshape(bsz, NP1, D_MODEL)
        kT = jnp.transpose(k3, (0, 2, 1))            # hoisted: ONE transpose per layer

        # ---- multi-head spatial attention over the (N+1) tokens (mask=None) ----
        ctxs = []
        for h in range(NUM_HEADS):                   # static unroll
            s = h * DEPTH
            qh = q3[:, :, s:s + DEPTH]               # (B, NP1, DEPTH) lane slice
            kTh = kT[:, s:s + DEPTH, :]              # (B, DEPTH, NP1) 8-sublane aligned
            vh = v3[:, :, s:s + DEPTH]
            logits = jnp.einsum('bqd,bdk->bqk', qh, kTh,
                                preferred_element_type=jnp.float32) * scale
            mx = jnp.max(logits, axis=-1, keepdims=True)
            ex = jnp.exp(logits - mx)
            p = ex * pl.reciprocal(jnp.sum(ex, axis=-1, keepdims=True), approx=True)
            ctxs.append(jnp.einsum('bqk,bkd->bqd', p, vh,
                                   preferred_element_type=jnp.float32))
        ctx_all = jnp.concatenate(ctxs, axis=-1)     # (B, NP1, D_MODEL), head-major lanes

        # ---- single fused output projection (one matmul instead of 4 per-head ones) ----
        attn = jnp.dot(ctx_all.reshape(m, D_MODEL), wo_ref[l],
                       preferred_element_type=jnp.float32) + bo_ref[l]

        # ---- residual + LayerNorm (torch semantics: biased var, eps=1e-5) ----
        y = tokens + attn
        mu = jnp.mean(y, axis=-1, keepdims=True)
        var = jnp.mean(jnp.square(y - mu), axis=-1, keepdims=True)
        tokens = (y - mu) * lax.rsqrt(var + LN_EPS) * gam_ref[l] + bet_ref[l]

    out_ref[...] = tokens                            # single dense flattened store


# ---------------- wrapper: one-time weight packing + pallas_call -------------------------
def spatial_transformer_forward(x, params):
    """x: (B, N_JOINTS, D_IN) -> (B, N_JOINTS+1, D_MODEL). Encoder-mode forward (context=None)."""
    b = x.shape[0]
    m = b * NP1

    # token 0 slot = cls; its (zero) input row never contributes (the row-select masks it out)
    x_ext = jnp.concatenate([jnp.zeros((b, 1, D_IN), jnp.float32), x], axis=1)   # (B, NP1, D_IN)
    x_flat = x_ext.reshape(m, D_IN)

    # per-row one-hot token-select columns: sel[r, t] = 1 iff row r is token t
    sel = jnp.asarray(np.tile(np.eye(NP1, dtype=np.float32), (b, 1)))            # (m, NP1)

    # embedding bias rows (cls token in row 0) tiled over batch
    bemb = jnp.concatenate([params['cls_token'][None, :], params['b_embed']], axis=0)  # (NP1, D)
    bemb_flat = jnp.tile(bemb, (b, 1))                                            # (m, D)

    # per-layer fused K|V weights / biases (shared linears)
    wkv = jnp.concatenate([params['wk'], params['wv']], axis=2)                   # (L, D, 2D)
    bkv = jnp.concatenate([params['bk'], params['bv']], axis=1)[:, None, :]       # (L, 1, 2D)

    # per-token Q bias, tiled to rows
    bq_flat = jnp.tile(params['bq'], (1, b, 1))                                   # (L, m, D)

    wo = params['wo']                                                             # (L, D, D)
    bo = params['bo'][:, None, :]                                                 # (L, 1, D)
    gam = params['ln_g'][:, None, :]
    bet = params['ln_b'][:, None, :]

    operands = (x_flat, sel, params['w_embed'], bemb_flat,
                params['wq'], bq_flat, wkv, bkv, wo, bo, gam, bet)

    flops = int(
        2 * N_JOINTS * m * D_IN * D_MODEL                                  # embedding
        + NUM_LAYERS * (2 * m * D_MODEL * (2 * D_MODEL)                    # K|V
                        + NP1 * 2 * m * D_MODEL * D_MODEL                  # per-token Q
                        + NUM_HEADS * 4 * b * NP1 * NP1 * DEPTH            # attn matmuls
                        + 2 * m * D_MODEL * D_MODEL))                      # Wo
    transcendentals = int(NUM_LAYERS * (NUM_HEADS * b * NP1 * (NP1 + 1) + m))
    bytes_accessed = int(4 * (sum(int(op.size) for op in operands) + m * D_MODEL))

    vmem_spec = pl.BlockSpec(memory_space=pltpu.MemorySpace.VMEM)
    out_flat = pl.pallas_call(
        _spatial_transformer_kernel,
        out_shape=jax.ShapeDtypeStruct((m, D_MODEL), jnp.float32),
        in_specs=[pl.BlockSpec(memory_space=pltpu.MemorySpace.VMEM) for _ in operands],
        out_specs=vmem_spec,
        compiler_params=pltpu.CompilerParams(vmem_limit_bytes=32 * 1024 * 1024),
        cost_estimate=pl.CostEstimate(flops=flops,
                                      transcendentals=transcendentals,
                                      bytes_accessed=bytes_accessed),
    )(*operands)
    return out_flat.reshape(b, NP1, D_MODEL)


# ---------------- pure-JAX reference mirroring the torch module --------------------------
def _reference(x, params):
    b = x.shape[0]
    emb = jnp.stack([x[:, j] @ params['w_embed'][j] + params['b_embed'][j]
                     for j in range(N_JOINTS)], axis=1)                          # (B, N, D)
    cls = jnp.broadcast_to(params['cls_token'][None, None, :], (b, 1, D_MODEL))
    h = jnp.concatenate([cls, emb], axis=1)                                      # (B, NP1, D)
    for l in range(NUM_LAYERS):
        k = h @ params['wk'][l] + params['bk'][l]
        v = h @ params['wv'][l] + params['bv'][l]
        q = jnp.stack([h[:, t] @ params['wq'][l][t] + params['bq'][l][t]
                       for t in range(NP1)], axis=1)

        def split(z):
            return z.reshape(b, NP1, NUM_HEADS, DEPTH).transpose(0, 2, 1, 3)

        qh, kh, vh = split(q), split(k), split(v)
        logits = jnp.einsum('bhqd,bhkd->bhqk', qh, kh) / math.sqrt(DEPTH)
        p = jax.nn.softmax(logits, axis=-1)
        o = jnp.einsum('bhqk,bhkd->bhqd', p, vh)
        o = o.transpose(0, 2, 1, 3).reshape(b, NP1, D_MODEL)
        o = o @ params['wo'][l] + params['bo'][l]
        y = h + o
        mu = y.mean(-1, keepdims=True)
        var = ((y - mu) ** 2).mean(-1, keepdims=True)
        h = (y - mu) / jnp.sqrt(var + LN_EPS) * params['ln_g'][l] + params['ln_b'][l]
    return h


# ---------------- main ----------------
if __name__ == "__main__":
    key = jax.random.PRNGKey(0)
    ks = jax.random.split(key, 14)
    params = {
        'cls_token': jax.random.normal(ks[0], (D_MODEL,), jnp.float32),
        'w_embed': 0.1 * jax.random.normal(ks[1], (N_JOINTS, D_IN, D_MODEL), jnp.float32),
        'b_embed': 0.1 * jax.random.normal(ks[2], (N_JOINTS, D_MODEL), jnp.float32),
        'wq': 0.1 * jax.random.normal(ks[3], (NUM_LAYERS, NP1, D_MODEL, D_MODEL), jnp.float32),
        'bq': 0.1 * jax.random.normal(ks[4], (NUM_LAYERS, NP1, D_MODEL), jnp.float32),
        'wk': 0.1 * jax.random.normal(ks[5], (NUM_LAYERS, D_MODEL, D_MODEL), jnp.float32),
        'bk': 0.1 * jax.random.normal(ks[6], (NUM_LAYERS, D_MODEL), jnp.float32),
        'wv': 0.1 * jax.random.normal(ks[7], (NUM_LAYERS, D_MODEL, D_MODEL), jnp.float32),
        'bv': 0.1 * jax.random.normal(ks[8], (NUM_LAYERS, D_MODEL), jnp.float32),
        'wo': 0.1 * jax.random.normal(ks[9], (NUM_LAYERS, D_MODEL, D_MODEL), jnp.float32),
        'bo': 0.1 * jax.random.normal(ks[10], (NUM_LAYERS, D_MODEL), jnp.float32),
        'ln_g': 1.0 + 0.1 * jax.random.normal(ks[11], (NUM_LAYERS, D_MODEL), jnp.float32),
        'ln_b': 0.1 * jax.random.normal(ks[12], (NUM_LAYERS, D_MODEL), jnp.float32),
    }
    x = jax.random.normal(ks[13], (B, N_JOINTS, D_IN), jnp.float32)

    # TODO(synk): decoder path (context/beta -> tau embedding cls token) and decode()'s
    #             per-joint output_proj are not exercised; only the encoder-mode forward
    #             (context=None), which is what SpatialTransformer.forward computes here.

    out = spatial_transformer_forward(x, params)
    out = jax.block_until_ready(out)

    ref = _reference(x, params)
    assert out.shape == (B, NP1, D_MODEL)
    # tolerance slightly relaxed for the EUP approximate reciprocal in the softmax
    np.testing.assert_allclose(np.asarray(out), np.asarray(ref), rtol=2e-3, atol=2e-3)
    print("KERNEL_OK")
</pallas_src>

<mosaic_0001>
module attributes {stable_mosaic.version = 11 : i64} {
  func.func @_spatial_transformer_kernel(%arg0: memref<10x16xf32, #tpu.memory_space<vmem>>, %arg1: memref<10x5xf32, #tpu.memory_space<vmem>>, %arg2: memref<4x16x32xf32, #tpu.memory_space<vmem>>, %arg3: memref<10x32xf32, #tpu.memory_space<vmem>>, %arg4: memref<2x5x32x32xf32, #tpu.memory_space<vmem>>, %arg5: memref<2x10x32xf32, #tpu.memory_space<vmem>>, %arg6: memref<2x32x64xf32, #tpu.memory_space<vmem>>, %arg7: memref<2x1x64xf32, #tpu.memory_space<vmem>>, %arg8: memref<2x32x32xf32, #tpu.memory_space<vmem>>, %arg9: memref<2x1x32xf32, #tpu.memory_space<vmem>>, %arg10: memref<2x1x32xf32, #tpu.memory_space<vmem>>, %arg11: memref<2x1x32xf32, #tpu.memory_space<vmem>>, %arg12: memref<10x32xf32, #tpu.memory_space<vmem>>) attributes {dimension_semantics = [], scalar_prefetch = 0 : i64, scratch_operands = 0 : i64, tpu.core_type = #tpu.core_type<tc>} {
    %c0 = arith.constant 0 : index
    %c0_0 = arith.constant 0 : index
    %0 = vector.load %arg0[%c0, %c0_0] : memref<10x16xf32, #tpu.memory_space<vmem>>, vector<10x16xf32>
    %c0_1 = arith.constant 0 : index
    %c0_2 = arith.constant 0 : index
    %1 = vector.load %arg1[%c0_1, %c0_2] : memref<10x5xf32, #tpu.memory_space<vmem>>, vector<10x5xf32>
    %c0_3 = arith.constant 0 : index
    %c0_4 = arith.constant 0 : index
    %2 = vector.load %arg3[%c0_3, %c0_4] : memref<10x32xf32, #tpu.memory_space<vmem>>, vector<10x32xf32>
    %3 = vector.extract_strided_slice %1 {offsets = [0, 1], sizes = [10, 1], strides = [1, 1]} : vector<10x5xf32> to vector<10x1xf32>
    %c0_5 = arith.constant 0 : index
    %c0_6 = arith.constant 0 : index
    %c0_7 = arith.constant 0 : index
    %4 = vector.load %arg2[%c0_5, %c0_6, %c0_7] : memref<4x16x32xf32, #tpu.memory_space<vmem>>, vector<1x16x32xf32>
    %5 = vector.shape_cast %4 : vector<1x16x32xf32> to vector<16x32xf32>
    %cst = arith.constant dense<0.000000e+00> : vector<10x32xf32>
    %6 = tpu.matmul %0, %5, %cst {dimension_numbers = #tpu.dot_dimension_numbers<[1], [0], [0], [1], [0, 0, 1, 1], [], []>} : vector<10x16xf32>, vector<16x32xf32>, vector<10x32xf32> -> vector<10x32xf32>
    %7 = vector.broadcast %3 : vector<10x1xf32> to vector<10x32xf32>
    %8 = arith.mulf %7, %6 : vector<10x32xf32>
    %9 = arith.addf %2, %8 : vector<10x32xf32>
    %10 = vector.extract_strided_slice %1 {offsets = [0, 2], sizes = [10, 1], strides = [1, 1]} : vector<10x5xf32> to vector<10x1xf32>
    %c1 = arith.constant 1 : index
    %c0_8 = arith.constant 0 : index
    %c0_9 = arith.constant 0 : index
    %11 = vector.load %arg2[%c1, %c0_8, %c0_9] : memref<4x16x32xf32, #tpu.memory_space<vmem>>, vector<1x16x32xf32>
    %12 = vector.shape_cast %11 : vector<1x16x32xf32> to vector<16x32xf32>
    %cst_10 = arith.constant dense<0.000000e+00> : vector<10x32xf32>
    %13 = tpu.matmul %0, %12, %cst_10 {dimension_numbers = #tpu.dot_dimension_numbers<[1], [0], [0], [1], [0, 0, 1, 1], [], []>} : vector<10x16xf32>, vector<16x32xf32>, vector<10x32xf32> -> vector<10x32xf32>
    %14 = vector.broadcast %10 : vector<10x1xf32> to vector<10x32xf32>
    %15 = arith.mulf %14, %13 : vector<10x32xf32>
    %16 = arith.addf %9, %15 : vector<10x32xf32>
    %17 = vector.extract_strided_slice %1 {offsets = [0, 3], sizes = [10, 1], strides = [1, 1]} : vector<10x5xf32> to vector<10x1xf32>
    %c2 = arith.constant 2 : index
    %c0_11 = arith.constant 0 : index
    %c0_12 = arith.constant 0 : index
    %18 = vector.load %arg2[%c2, %c0_11, %c0_12] : memref<4x16x32xf32, #tpu.memory_space<vmem>>, vector<1x16x32xf32>
    %19 = vector.shape_cast %18 : vector<1x16x32xf32> to vector<16x32xf32>
    %cst_13 = arith.constant dense<0.000000e+00> : vector<10x32xf32>
    %20 = tpu.matmul %0, %19, %cst_13 {dimension_numbers = #tpu.dot_dimension_numbers<[1], [0], [0], [1], [0, 0, 1, 1], [], []>} : vector<10x16xf32>, vector<16x32xf32>, vector<10x32xf32> -> vector<10x32xf32>
    %21 = vector.broadcast %17 : vector<10x1xf32> to vector<10x32xf32>
    %22 = arith.mulf %21, %20 : vector<10x32xf32>
    %23 = arith.addf %16, %22 : vector<10x32xf32>
    %24 = vector.extract_strided_slice %1 {offsets = [0, 4], sizes = [10, 1], strides = [1, 1]} : vector<10x5xf32> to vector<10x1xf32>
    %c3 = arith.constant 3 : index
    %c0_14 = arith.constant 0 : index
    %c0_15 = arith.constant 0 : index
    %25 = vector.load %arg2[%c3, %c0_14, %c0_15] : memref<4x16x32xf32, #tpu.memory_space<vmem>>, vector<1x16x32xf32>
    %26 = vector.shape_cast %25 : vector<1x16x32xf32> to vector<16x32xf32>
    %cst_16 = arith.constant dense<0.000000e+00> : vector<10x32xf32>
    %27 = tpu.matmul %0, %26, %cst_16 {dimension_numbers = #tpu.dot_dimension_numbers<[1], [0], [0], [1], [0, 0, 1, 1], [], []>} : vector<10x16xf32>, vector<16x32xf32>, vector<10x32xf32> -> vector<10x32xf32>
    %28 = vector.broadcast %24 : vector<10x1xf32> to vector<10x32xf32>
    %29 = arith.mulf %28, %27 : vector<10x32xf32>
    %30 = arith.addf %23, %29 : vector<10x32xf32>
    %c0_17 = arith.constant 0 : index
    %c0_18 = arith.constant 0 : index
    %c0_19 = arith.constant 0 : index
    %31 = vector.load %arg6[%c0_17, %c0_18, %c0_19] : memref<2x32x64xf32, #tpu.memory_space<vmem>>, vector<1x32x64xf32>
    %32 = vector.shape_cast %31 : vector<1x32x64xf32> to vector<32x64xf32>
    %cst_20 = arith.constant dense<0.000000e+00> : vector<10x64xf32>
    %33 = tpu.matmul %30, %32, %cst_20 {dimension_numbers = #tpu.dot_dimension_numbers<[1], [0], [0], [1], [0, 0, 1, 1], [], []>} : vector<10x32xf32>, vector<32x64xf32>, vector<10x64xf32> -> vector<10x64xf32>
    %c0_21 = arith.constant 0 : index
    %c0_22 = arith.constant 0 : index
    %c0_23 = arith.constant 0 : index
    %34 = vector.load %arg7[%c0_21, %c0_22, %c0_23] : memref<2x1x64xf32, #tpu.memory_space<vmem>>, vector<1x1x64xf32>
    %35 = vector.shape_cast %34 : vector<1x1x64xf32> to vector<1x64xf32>
    %36 = vector.broadcast %35 : vector<1x64xf32> to vector<10x64xf32>
    %37 = arith.addf %33, %36 : vector<10x64xf32>
    %38 = vector.extract_strided_slice %37 {offsets = [0, 0], sizes = [10, 32], strides = [1, 1]} : vector<10x64xf32> to vector<10x32xf32>
    %39 = vector.extract_strided_slice %37 {offsets = [0, 32], sizes = [10, 32], strides = [1, 1]} : vector<10x64xf32> to vector<10x32xf32>
    %c0_24 = arith.constant 0 : index
    %c0_25 = arith.constant 0 : index
    %c0_26 = arith.constant 0 : index
    %40 = vector.load %arg5[%c0_24, %c0_25, %c0_26] : memref<2x10x32xf32, #tpu.memory_space<vmem>>, vector<1x10x32xf32>
    %41 = vector.shape_cast %40 : vector<1x10x32xf32> to vector<10x32xf32>
    %42 = vector.extract_strided_slice %1 {offsets = [0, 0], sizes = [10, 1], strides = [1, 1]} : vector<10x5xf32> to vector<10x1xf32>
    %c0_27 = arith.constant 0 : index
    %c0_28 = arith.constant 0 : index
    %c0_29 = arith.constant 0 : index
    %c0_30 = arith.constant 0 : index
    %43 = vector.load %arg4[%c0_27, %c0_28, %c0_29, %c0_30] : memref<2x5x32x32xf32, #tpu.memory_space<vmem>>, vector<1x1x32x32xf32>
    %44 = vector.shape_cast %43 : vector<1x1x32x32xf32> to vector<32x32xf32>
    %cst_31 = arith.constant dense<0.000000e+00> : vector<10x32xf32>
    %45 = tpu.matmul %30, %44, %cst_31 {dimension_numbers = #tpu.dot_dimension_numbers<[1], [0], [0], [1], [0, 0, 1, 1], [], []>} : vector<10x32xf32>, vector<32x32xf32>, vector<10x32xf32> -> vector<10x32xf32>
    %46 = vector.broadcast %42 : vector<10x1xf32> to vector<10x32xf32>
    %47 = arith.mulf %46, %45 : vector<10x32xf32>
    %48 = arith.addf %41, %47 : vector<10x32xf32>
    %49 = vector.extract_strided_slice %1 {offsets = [0, 1], sizes = [10, 1], strides = [1, 1]} : vector<10x5xf32> to vector<10x1xf32>
    %c0_32 = arith.constant 0 : index
    %c1_33 = arith.constant 1 : index
    %c0_34 = arith.constant 0 : index
    %c0_35 = arith.constant 0 : index
    %50 = vector.load %arg4[%c0_32, %c1_33, %c0_34, %c0_35] : memref<2x5x32x32xf32, #tpu.memory_space<vmem>>, vector<1x1x32x32xf32>
    %51 = vector.shape_cast %50 : vector<1x1x32x32xf32> to vector<32x32xf32>
    %cst_36 = arith.constant dense<0.000000e+00> : vector<10x32xf32>
    %52 = tpu.matmul %30, %51, %cst_36 {dimension_numbers = #tpu.dot_dimension_numbers<[1], [0], [0], [1], [0, 0, 1, 1], [], []>} : vector<10x32xf32>, vector<32x32xf32>, vector<10x32xf32> -> vector<10x32xf32>
    %53 = vector.broadcast %49 : vector<10x1xf32> to vector<10x32xf32>
    %54 = arith.mulf %53, %52 : vector<10x32xf32>
    %55 = arith.addf %48, %54 : vector<10x32xf32>
    %56 = vector.extract_strided_slice %1 {offsets = [0, 2], sizes = [10, 1], strides = [1, 1]} : vector<10x5xf32> to vector<10x1xf32>
    %c0_37 = arith.constant 0 : index
    %c2_38 = arith.constant 2 : index
    %c0_39 = arith.constant 0 : index
    %c0_40 = arith.constant 0 : index
    %57 = vector.load %arg4[%c0_37, %c2_38, %c0_39, %c0_40] : memref<2x5x32x32xf32, #tpu.memory_space<vmem>>, vector<1x1x32x32xf32>
    %58 = vector.shape_cast %57 : vector<1x1x32x32xf32> to vector<32x32xf32>
    %cst_41 = arith.constant dense<0.000000e+00> : vector<10x32xf32>
    %59 = tpu.matmul %30, %58, %cst_41 {dimension_numbers = #tpu.dot_dimension_numbers<[1], [0], [0], [1], [0, 0, 1, 1], [], []>} : vector<10x32xf32>, vector<32x32xf32>, vector<10x32xf32> -> vector<10x32xf32>
    %60 = vector.broadcast %56 : vector<10x1xf32> to vector<10x32xf32>
    %61 = arith.mulf %60, %59 : vector<10x32xf32>
    %62 = arith.addf %55, %61 : vector<10x32xf32>
    %63 = vector.extract_strided_slice %1 {offsets = [0, 3], sizes = [10, 1], strides = [1, 1]} : vector<10x5xf32> to vector<10x1xf32>
    %c0_42 = arith.constant 0 : index
    %c3_43 = arith.constant 3 : index
    %c0_44 = arith.constant 0 : index
    %c0_45 = arith.constant 0 : index
    %64 = vector.load %arg4[%c0_42, %c3_43, %c0_44, %c0_45] : memref<2x5x32x32xf32, #tpu.memory_space<vmem>>, vector<1x1x32x32xf32>
    %65 = vector.shape_cast %64 : vector<1x1x32x32xf32> to vector<32x32xf32>
    %cst_46 = arith.constant dense<0.000000e+00> : vector<10x32xf32>
    %66 = tpu.matmul %30, %65, %cst_46 {dimension_numbers = #tpu.dot_dimension_numbers<[1], [0], [0], [1], [0, 0, 1, 1], [], []>} : vector<10x32xf32>, vector<32x32xf32>, vector<10x32xf32> -> vector<10x32xf32>
    %67 = vector.broadcast %63 : vector<10x1xf32> to vector<10x32xf32>
    %68 = arith.mulf %67, %66 : vector<10x32xf32>
    %69 = arith.addf %62, %68 : vector<10x32xf32>
    %70 = vector.extract_strided_slice %1 {offsets = [0, 4], sizes = [10, 1], strides = [1, 1]} : vector<10x5xf32> to vector<10x1xf32>
    %c0_47 = arith.constant 0 : index
    %c4 = arith.constant 4 : index
    %c0_48 = arith.constant 0 : index
    %c0_49 = arith.constant 0 : index
    %71 = vector.load %arg4[%c0_47, %c4, %c0_48, %c0_49] : memref<2x5x32x32xf32, #tpu.memory_space<vmem>>, vector<1x1x32x32xf32>
    %72 = vector.shape_cast %71 : vector<1x1x32x32xf32> to vector<32x32xf32>
    %cst_50 = arith.constant dense<0.000000e+00> : vector<10x32xf32>
    %73 = tpu.matmul %30, %72, %cst_50 {dimension_numbers = #tpu.dot_dimension_numbers<[1], [0], [0], [1], [0, 0, 1, 1], [], []>} : vector<10x32xf32>, vector<32x32xf32>, vector<10x32xf32> -> vector<10x32xf32>
    %74 = vector.broadcast %70 : vector<10x1xf32> to vector<10x32xf32>
    %75 = arith.mulf %74, %73 : vector<10x32xf32>
    %76 = arith.addf %69, %75 : vector<10x32xf32>
    %77 = vector.shape_cast %76 : vector<10x32xf32> to vector<2x5x32xf32>
    %78 = vector.shape_cast %38 : vector<10x32xf32> to vector<2x5x32xf32>
    %79 = vector.shape_cast %39 : vector<10x32xf32> to vector<2x5x32xf32>
    %80 = tpu.transpose %78, [0, 2, 1] : vector<2x5x32xf32> -> vector<2x32x5xf32>
    %81 = vector.extract_strided_slice %77 {offsets = [0, 0, 0], sizes = [2, 5, 8], strides = [1, 1, 1]} : vector<2x5x32xf32> to vector<2x5x8xf32>
    %82 = vector.extract_strided_slice %80 {offsets = [0, 0, 0], sizes = [2, 8, 5], strides = [1, 1, 1]} : vector<2x32x5xf32> to vector<2x8x5xf32>
    %83 = vector.extract_strided_slice %79 {offsets = [0, 0, 0], sizes = [2, 5, 8], strides = [1, 1, 1]} : vector<2x5x32xf32> to vector<2x5x8xf32>
    "tpu.trace_start"() <{level = 10 : i32, message = "bqd,bdk->bqk"}> : () -> ()
    %cst_51 = arith.constant dense<0.000000e+00> : vector<2x5x5xf32>
    %84 = tpu.matmul %81, %82, %cst_51 {dimension_numbers = #tpu.dot_dimension_numbers<[2], [1], [1], [2], [0, 0, 0, 1, 1, 2], [0], [0]>} : vector<2x5x8xf32>, vector<2x8x5xf32>, vector<2x5x5xf32> -> vector<2x5x5xf32>
    "tpu.trace_stop"() : () -> ()
    %cst_52 = arith.constant 0.353553385 : f32
    %85 = vector.broadcast %cst_52 : f32 to vector<2x5x5xf32>
    %86 = arith.mulf %84, %85 : vector<2x5x5xf32>
    %cst_53 = arith.constant dense<0xFF800000> : vector<2x5xf32>
    %87 = vector.multi_reduction <maximumf>, %86, %cst_53 [2] : vector<2x5x5xf32> to vector<2x5xf32>
    %88 = vector.shape_cast %87 : vector<2x5xf32> to vector<2x5x1xf32>
    %89 = vector.broadcast %88 : vector<2x5x1xf32> to vector<2x5x5xf32>
    %90 = arith.subf %86, %89 : vector<2x5x5xf32>
    %91 = math.exp %90 : vector<2x5x5xf32>
    %cst_54 = arith.constant dense<0.000000e+00> : vector<2x5xf32>
    %92 = vector.multi_reduction <add>, %91, %cst_54 [2] : vector<2x5x5xf32> to vector<2x5xf32>
    %93 = vector.shape_cast %92 : vector<2x5xf32> to vector<2x5x1xf32>
    %94 = tpu.reciprocal %93 {approx = true} : vector<2x5x1xf32> -> vector<2x5x1xf32>
    %95 = vector.broadcast %94 : vector<2x5x1xf32> to vector<2x5x5xf32>
    %96 = arith.mulf %91, %95 : vector<2x5x5xf32>
    "tpu.trace_start"() <{level = 10 : i32, message = "bqk,bkd->bqd"}> : () -> ()
    %cst_55 = arith.constant dense<0.000000e+00> : vector<2x5x8xf32>
    %97 = tpu.matmul %96, %83, %cst_55 {dimension_numbers = #tpu.dot_dimension_numbers<[2], [1], [1], [2], [0, 0, 0, 1, 1, 2], [0], [0]>} : vector<2x5x5xf32>, vector<2x5x8xf32>, vector<2x5x8xf32> -> vector<2x5x8xf32>
    "tpu.trace_stop"() : () -> ()
    %98 = vector.extract_strided_slice %77 {offsets = [0, 0, 8], sizes = [2, 5, 8], strides = [1, 1, 1]} : vector<2x5x32xf32> to vector<2x5x8xf32>
    %99 = vector.extract_strided_slice %80 {offsets = [0, 8, 0], sizes = [2, 8, 5], strides = [1, 1, 1]} : vector<2x32x5xf32> to vector<2x8x5xf32>
    %100 = vector.extract_strided_slice %79 {offsets = [0, 0, 8], sizes = [2, 5, 8], strides = [1, 1, 1]} : vector<2x5x32xf32> to vector<2x5x8xf32>
    "tpu.trace_start"() <{level = 10 : i32, message = "bqd,bdk->bqk"}> : () -> ()
    %cst_56 = arith.constant dense<0.000000e+00> : vector<2x5x5xf32>
    %101 = tpu.matmul %98, %99, %cst_56 {dimension_numbers = #tpu.dot_dimension_numbers<[2], [1], [1], [2], [0, 0, 0, 1, 1, 2], [0], [0]>} : vector<2x5x8xf32>, vector<2x8x5xf32>, vector<2x5x5xf32> -> vector<2x5x5xf32>
    "tpu.trace_stop"() : () -> ()
    %cst_57 = arith.constant 0.353553385 : f32
    %102 = vector.broadcast %cst_57 : f32 to vector<2x5x5xf32>
    %103 = arith.mulf %101, %102 : vector<2x5x5xf32>
    %cst_58 = arith.constant dense<0xFF800000> : vector<2x5xf32>
    %104 = vector.multi_reduction <maximumf>, %103, %cst_58 [2] : vector<2x5x5xf32> to vector<2x5xf32>
    %105 = vector.shape_cast %104 : vector<2x5xf32> to vector<2x5x1xf32>
    %106 = vector.broadcast %105 : vector<2x5x1xf32> to vector<2x5x5xf32>
    %107 = arith.subf %103, %106 : vector<2x5x5xf32>
    %108 = math.exp %107 : vector<2x5x5xf32>
    %cst_59 = arith.constant dense<0.000000e+00> : vector<2x5xf32>
    %109 = vector.multi_reduction <add>, %108, %cst_59 [2] : vector<2x5x5xf32> to vector<2x5xf32>
    %110 = vector.shape_cast %109 : vector<2x5xf32> to vector<2x5x1xf32>
    %111 = tpu.reciprocal %110 {approx = true} : vector<2x5x1xf32> -> vector<2x5x1xf32>
    %112 = vector.broadcast %111 : vector<2x5x1xf32> to vector<2x5x5xf32>
    %113 = arith.mulf %108, %112 : vector<2x5x5xf32>
    "tpu.trace_start"() <{level = 10 : i32, message = "bqk,bkd->bqd"}> : () -> ()
    %cst_60 = arith.constant dense<0.000000e+00> : vector<2x5x8xf32>
    %114 = tpu.matmul %113, %100, %cst_60 {dimension_numbers = #tpu.dot_dimension_numbers<[2], [1], [1], [2], [0, 0, 0, 1, 1, 2], [0], [0]>} : vector<2x5x5xf32>, vector<2x5x8xf32>, vector<2x5x8xf32> -> vector<2x5x8xf32>
    "tpu.trace_stop"() : () -> ()
    %115 = vector.extract_strided_slice %77 {offsets = [0, 0, 16], sizes = [2, 5, 8], strides = [1, 1, 1]} : vector<2x5x32xf32> to vector<2x5x8xf32>
    %116 = vector.extract_strided_slice %80 {offsets = [0, 16, 0], sizes = [2, 8, 5], strides = [1, 1, 1]} : vector<2x32x5xf32> to vector<2x8x5xf32>
    %117 = vector.extract_strided_slice %79 {offsets = [0, 0, 16], sizes = [2, 5, 8], strides = [1, 1, 1]} : vector<2x5x32xf32> to vector<2x5x8xf32>
    "tpu.trace_start"() <{level = 10 : i32, message = "bqd,bdk->bqk"}> : () -> ()
    %cst_61 = arith.constant dense<0.000000e+00> : vector<2x5x5xf32>
    %118 = tpu.matmul %115, %116, %cst_61 {dimension_numbers = #tpu.dot_dimension_numbers<[2], [1], [1], [2], [0, 0, 0, 1, 1, 2], [0], [0]>} : vector<2x5x8xf32>, vector<2x8x5xf32>, vector<2x5x5xf32> -> vector<2x5x5xf32>
    "tpu.trace_stop"() : () -> ()
    %cst_62 = arith.constant 0.353553385 : f32
    %119 = vector.broadcast %cst_62 : f32 to vector<2x5x5xf32>
    %120 = arith.mulf %118, %119 : vector<2x5x5xf32>
    %cst_63 = arith.constant dense<0xFF800000> : vector<2x5xf32>
    %121 = vector.multi_reduction <maximumf>, %120, %cst_63 [2] : vector<2x5x5xf32> to vector<2x5xf32>
    %122 = vector.shape_cast %121 : vector<2x5xf32> to vector<2x5x1xf32>
    %123 = vector.broadcast %122 : vector<2x5x1xf32> to vector<2x5x5xf32>
    %124 = arith.subf %120, %123 : vector<2x5x5xf32>
    %125 = math.exp %124 : vector<2x5x5xf32>
    %cst_64 = arith.constant dense<0.000000e+00> : vector<2x5xf32>
    %126 = vector.multi_reduction <add>, %125, %cst_64 [2] : vector<2x5x5xf32> to vector<2x5xf32>
    %127 = vector.shape_cast %126 : vector<2x5xf32> to vector<2x5x1xf32>
    %128 = tpu.reciprocal %127 {approx = true} : vector<2x5x1xf32> -> vector<2x5x1xf32>
    %129 = vector.broadcast %128 : vector<2x5x1xf32> to vector<2x5x5xf32>
    %130 = arith.mulf %125, %129 : vector<2x5x5xf32>
    "tpu.trace_start"() <{level = 10 : i32, message = "bqk,bkd->bqd"}> : () -> ()
    %cst_65 = arith.constant dense<0.000000e+00> : vector<2x5x8xf32>
    %131 = tpu.matmul %130, %117, %cst_65 {dimension_numbers = #tpu.dot_dimension_numbers<[2], [1], [1], [2], [0, 0, 0, 1, 1, 2], [0], [0]>} : vector<2x5x5xf32>, vector<2x5x8xf32>, vector<2x5x8xf32> -> vector<2x5x8xf32>
    "tpu.trace_stop"() : () -> ()
    %132 = vector.extract_strided_slice %77 {offsets = [0, 0, 24], sizes = [2, 5, 8], strides = [1, 1, 1]} : vector<2x5x32xf32> to vector<2x5x8xf32>
    %133 = vector.extract_strided_slice %80 {offsets = [0, 24, 0], sizes = [2, 8, 5], strides = [1, 1, 1]} : vector<2x32x5xf32> to vector<2x8x5xf32>
    %134 = vector.extract_strided_slice %79 {offsets = [0, 0, 24], sizes = [2, 5, 8], strides = [1, 1, 1]} : vector<2x5x32xf32> to vector<2x5x8xf32>
    "tpu.trace_start"() <{level = 10 : i32, message = "bqd,bdk->bqk"}> : () -> ()
    %cst_66 = arith.constant dense<0.000000e+00> : vector<2x5x5xf32>
    %135 = tpu.matmul %132, %133, %cst_66 {dimension_numbers = #tpu.dot_dimension_numbers<[2], [1], [1], [2], [0, 0, 0, 1, 1, 2], [0], [0]>} : vector<2x5x8xf32>, vector<2x8x5xf32>, vector<2x5x5xf32> -> vector<2x5x5xf32>
    "tpu.trace_stop"() : () -> ()
    %cst_67 = arith.constant 0.353553385 : f32
    %136 = vector.broadcast %cst_67 : f32 to vector<2x5x5xf32>
    %137 = arith.mulf %135, %136 : vector<2x5x5xf32>
    %cst_68 = arith.constant dense<0xFF800000> : vector<2x5xf32>
    %138 = vector.multi_reduction <maximumf>, %137, %cst_68 [2] : vector<2x5x5xf32> to vector<2x5xf32>
    %139 = vector.shape_cast %138 : vector<2x5xf32> to vector<2x5x1xf32>
    %140 = vector.broadcast %139 : vector<2x5x1xf32> to vector<2x5x5xf32>
    %141 = arith.subf %137, %140 : vector<2x5x5xf32>
    %142 = math.exp %141 : vector<2x5x5xf32>
    %cst_69 = arith.constant dense<0.000000e+00> : vector<2x5xf32>
    %143 = vector.multi_reduction <add>, %142, %cst_69 [2] : vector<2x5x5xf32> to vector<2x5xf32>
    %144 = vector.shape_cast %143 : vector<2x5xf32> to vector<2x5x1xf32>
    %145 = tpu.reciprocal %144 {approx = true} : vector<2x5x1xf32> -> vector<2x5x1xf32>
    %146 = vector.broadcast %145 : vector<2x5x1xf32> to vector<2x5x5xf32>
    %147 = arith.mulf %142, %146 : vector<2x5x5xf32>
    "tpu.trace_start"() <{level = 10 : i32, message = "bqk,bkd->bqd"}> : () -> ()
    %cst_70 = arith.constant dense<0.000000e+00> : vector<2x5x8xf32>
    %148 = tpu.matmul %147, %134, %cst_70 {dimension_numbers = #tpu.dot_dimension_numbers<[2], [1], [1], [2], [0, 0, 0, 1, 1, 2], [0], [0]>} : vector<2x5x5xf32>, vector<2x5x8xf32>, vector<2x5x8xf32> -> vector<2x5x8xf32>
    "tpu.trace_stop"() : () -> ()
    %149 = tpu.concatenate %97, %114, %131, %148 in 2 : vector<2x5x8xf32>, vector<2x5x8xf32>, vector<2x5x8xf32>, vector<2x5x8xf32> -> vector<2x5x32xf32>
    %150 = vector.shape_cast %149 : vector<2x5x32xf32> to vector<10x32xf32>
    %c0_71 = arith.constant 0 : index
    %c0_72 = arith.constant 0 : index
    %c0_73 = arith.constant 0 : index
    %151 = vector.load %arg8[%c0_71, %c0_72, %c0_73] : memref<2x32x32xf32, #tpu.memory_space<vmem>>, vector<1x32x32xf32>
    %152 = vector.shape_cast %151 : vector<1x32x32xf32> to vector<32x32xf32>
    %cst_74 = arith.constant dense<0.000000e+00> : vector<10x32xf32>
    %153 = tpu.matmul %150, %152, %cst_74 {dimension_numbers = #tpu.dot_dimension_numbers<[1], [0], [0], [1], [0, 0, 1, 1], [], []>} : vector<10x32xf32>, vector<32x32xf32>, vector<10x32xf32> -> vector<10x32xf32>
    %c0_75 = arith.constant 0 : index
    %c0_76 = arith.constant 0 : index
    %c0_77 = arith.constant 0 : index
    %154 = vector.load %arg9[%c0_75, %c0_76, %c0_77] : memref<2x1x32xf32, #tpu.memory_space<vmem>>, vector<1x1x32xf32>
    %155 = vector.shape_cast %154 : vector<1x1x32xf32> to vector<1x32xf32>
    %156 = vector.broadcast %155 : vector<1x32xf32> to vector<10x32xf32>
    %157 = arith.addf %153, %156 : vector<10x32xf32>
    %158 = arith.addf %30, %157 : vector<10x32xf32>
    %cst_78 = arith.constant dense<0.000000e+00> : vector<10xf32>
    %159 = vector.multi_reduction <add>, %158, %cst_78 [1] : vector<10x32xf32> to vector<10xf32>
    %160 = vector.shape_cast %159 : vector<10xf32> to vector<10x1xf32>
    %cst_79 = arith.constant 3.200000e+01 : f32
    %161 = vector.broadcast %cst_79 : f32 to vector<10x1xf32>
    %162 = arith.divf %160, %161 : vector<10x1xf32>
    %163 = vector.broadcast %162 : vector<10x1xf32> to vector<10x32xf32>
    %164 = arith.subf %158, %163 : vector<10x32xf32>
    %165 = arith.mulf %164, %164 : vector<10x32xf32>
    %cst_80 = arith.constant dense<0.000000e+00> : vector<10xf32>
    %166 = vector.multi_reduction <add>, %165, %cst_80 [1] : vector<10x32xf32> to vector<10xf32>
    %167 = vector.shape_cast %166 : vector<10xf32> to vector<10x1xf32>
    %cst_81 = arith.constant 3.200000e+01 : f32
    %168 = vector.broadcast %cst_81 : f32 to vector<10x1xf32>
    %169 = arith.divf %167, %168 : vector<10x1xf32>
    %170 = vector.broadcast %162 : vector<10x1xf32> to vector<10x32xf32>
    %171 = arith.subf %158, %170 : vector<10x32xf32>
    %cst_82 = arith.constant 9.99999974E-6 : f32
    %172 = vector.broadcast %cst_82 : f32 to vector<10x1xf32>
    %173 = arith.addf %169, %172 : vector<10x1xf32>
    %174 = math.rsqrt %173 : vector<10x1xf32>
    %175 = vector.broadcast %174 : vector<10x1xf32> to vector<10x32xf32>
    %176 = arith.mulf %171, %175 : vector<10x32xf32>
    %c0_83 = arith.constant 0 : index
    %c0_84 = arith.constant 0 : index
    %c0_85 = arith.constant 0 : index
    %177 = vector.load %arg10[%c0_83, %c0_84, %c0_85] : memref<2x1x32xf32, #tpu.memory_space<vmem>>, vector<1x1x32xf32>
    %178 = vector.shape_cast %177 : vector<1x1x32xf32> to vector<1x32xf32>
    %179 = vector.broadcast %178 : vector<1x32xf32> to vector<10x32xf32>
    %180 = arith.mulf %176, %179 : vector<10x32xf32>
    %c0_86 = arith.constant 0 : index
    %c0_87 = arith.constant 0 : index
    %c0_88 = arith.constant 0 : index
    %181 = vector.load %arg11[%c0_86, %c0_87, %c0_88] : memref<2x1x32xf32, #tpu.memory_space<vmem>>, vector<1x1x32xf32>
    %182 = vector.shape_cast %181 : vector<1x1x32xf32> to vector<1x32xf32>
    %183 = vector.broadcast %182 : vector<1x32xf32> to vector<10x32xf32>
    %184 = arith.addf %180, %183 : vector<10x32xf32>
    %c1_89 = arith.constant 1 : index
    %c0_90 = arith.constant 0 : index
    %c0_91 = arith.constant 0 : index
    %185 = vector.load %arg6[%c1_89, %c0_90, %c0_91] : memref<2x32x64xf32, #tpu.memory_space<vmem>>, vector<1x32x64xf32>
    %186 = vector.shape_cast %185 : vector<1x32x64xf32> to vector<32x64xf32>
    %cst_92 = arith.constant dense<0.000000e+00> : vector<10x64xf32>
    %187 = tpu.matmul %184, %186, %cst_92 {dimension_numbers = #tpu.dot_dimension_numbers<[1], [0], [0], [1], [0, 0, 1, 1], [], []>} : vector<10x32xf32>, vector<32x64xf32>, vector<10x64xf32> -> vector<10x64xf32>
    %c1_93 = arith.constant 1 : index
    %c0_94 = arith.constant 0 : index
    %c0_95 = arith.constant 0 : index
    %188 = vector.load %arg7[%c1_93, %c0_94, %c0_95] : memref<2x1x64xf32, #tpu.memory_space<vmem>>, vector<1x1x64xf32>
    %189 = vector.shape_cast %188 : vector<1x1x64xf32> to vector<1x64xf32>
    %190 = vector.broadcast %189 : vector<1x64xf32> to vector<10x64xf32>
    %191 = arith.addf %187, %190 : vector<10x64xf32>
    %192 = vector.extract_strided_slice %191 {offsets = [0, 0], sizes = [10, 32], strides = [1, 1]} : vector<10x64xf32> to vector<10x32xf32>
    %193 = vector.extract_strided_slice %191 {offsets = [0, 32], sizes = [10, 32], strides = [1, 1]} : vector<10x64xf32> to vector<10x32xf32>
    %c1_96 = arith.constant 1 : index
    %c0_97 = arith.constant 0 : index
    %c0_98 = arith.constant 0 : index
    %194 = vector.load %arg5[%c1_96, %c0_97, %c0_98] : memref<2x10x32xf32, #tpu.memory_space<vmem>>, vector<1x10x32xf32>
    %195 = vector.shape_cast %194 : vector<1x10x32xf32> to vector<10x32xf32>
    %196 = vector.extract_strided_slice %1 {offsets = [0, 0], sizes = [10, 1], strides = [1, 1]} : vector<10x5xf32> to vector<10x1xf32>
    %c1_99 = arith.constant 1 : index
    %c0_100 = arith.constant 0 : index
    %c0_101 = arith.constant 0 : index
    %c0_102 = arith.constant 0 : index
    %197 = vector.load %arg4[%c1_99, %c0_100, %c0_101, %c0_102] : memref<2x5x32x32xf32, #tpu.memory_space<vmem>>, vector<1x1x32x32xf32>
    %198 = vector.shape_cast %197 : vector<1x1x32x32xf32> to vector<32x32xf32>
    %cst_103 = arith.constant dense<0.000000e+00> : vector<10x32xf32>
    %199 = tpu.matmul %184, %198, %cst_103 {dimension_numbers = #tpu.dot_dimension_numbers<[1], [0], [0], [1], [0, 0, 1, 1], [], []>} : vector<10x32xf32>, vector<32x32xf32>, vector<10x32xf32> -> vector<10x32xf32>
    %200 = vector.broadcast %196 : vector<10x1xf32> to vector<10x32xf32>
    %201 = arith.mulf %200, %199 : vector<10x32xf32>
    %202 = arith.addf %195, %201 : vector<10x32xf32>
    %203 = vector.extract_strided_slice %1 {offsets = [0, 1], sizes = [10, 1], strides = [1, 1]} : vector<10x5xf32> to vector<10x1xf32>
    %c1_104 = arith.constant 1 : index
    %c1_105 = arith.constant 1 : index
    %c0_106 = arith.constant 0 : index
    %c0_107 = arith.constant 0 : index
    %204 = vector.load %arg4[%c1_104, %c1_105, %c0_106, %c0_107] : memref<2x5x32x32xf32, #tpu.memory_space<vmem>>, vector<1x1x32x32xf32>
    %205 = vector.shape_cast %204 : vector<1x1x32x32xf32> to vector<32x32xf32>
    %cst_108 = arith.constant dense<0.000000e+00> : vector<10x32xf32>
    %206 = tpu.matmul %184, %205, %cst_108 {dimension_numbers = #tpu.dot_dimension_numbers<[1], [0], [0], [1], [0, 0, 1, 1], [], []>} : vector<10x32xf32>, vector<32x32xf32>, vector<10x32xf32> -> vector<10x32xf32>
    %207 = vector.broadcast %203 : vector<10x1xf32> to vector<10x32xf32>
    %208 = arith.mulf %207, %206 : vector<10x32xf32>
    %209 = arith.addf %202, %208 : vector<10x32xf32>
    %210 = vector.extract_strided_slice %1 {offsets = [0, 2], sizes = [10, 1], strides = [1, 1]} : vector<10x5xf32> to vector<10x1xf32>
    %c1_109 = arith.constant 1 : index
    %c2_110 = arith.constant 2 : index
    %c0_111 = arith.constant 0 : index
    %c0_112 = arith.constant 0 : index
    %211 = vector.load %arg4[%c1_109, %c2_110, %c0_111, %c0_112] : memref<2x5x32x32xf32, #tpu.memory_space<vmem>>, vector<1x1x32x32xf32>
    %212 = vector.shape_cast %211 : vector<1x1x32x32xf32> to vector<32x32xf32>
    %cst_113 = arith.constant dense<0.000000e+00> : vector<10x32xf32>
    %213 = tpu.matmul %184, %212, %cst_113 {dimension_numbers = #tpu.dot_dimension_numbers<[1], [0], [0], [1], [0, 0, 1, 1], [], []>} : vector<10x32xf32>, vector<32x32xf32>, vector<10x32xf32> -> vector<10x32xf32>
    %214 = vector.broadcast %210 : vector<10x1xf32> to vector<10x32xf32>
    %215 = arith.mulf %214, %213 : vector<10x32xf32>
    %216 = arith.addf %209, %215 : vector<10x32xf32>
    %217 = vector.extract_strided_slice %1 {offsets = [0, 3], sizes = [10, 1], strides = [1, 1]} : vector<10x5xf32> to vector<10x1xf32>
    %c1_114 = arith.constant 1 : index
    %c3_115 = arith.constant 3 : index
    %c0_116 = arith.constant 0 : index
    %c0_117 = arith.constant 0 : index
    %218 = vector.load %arg4[%c1_114, %c3_115, %c0_116, %c0_117] : memref<2x5x32x32xf32, #tpu.memory_space<vmem>>, vector<1x1x32x32xf32>
    %219 = vector.shape_cast %218 : vector<1x1x32x32xf32> to vector<32x32xf32>
    %cst_118 = arith.constant dense<0.000000e+00> : vector<10x32xf32>
    %220 = tpu.matmul %184, %219, %cst_118 {dimension_numbers = #tpu.dot_dimension_numbers<[1], [0], [0], [1], [0, 0, 1, 1], [], []>} : vector<10x32xf32>, vector<32x32xf32>, vector<10x32xf32> -> vector<10x32xf32>
    %221 = vector.broadcast %217 : vector<10x1xf32> to vector<10x32xf32>
    %222 = arith.mulf %221, %220 : vector<10x32xf32>
    %223 = arith.addf %216, %222 : vector<10x32xf32>
    %224 = vector.extract_strided_slice %1 {offsets = [0, 4], sizes = [10, 1], strides = [1, 1]} : vector<10x5xf32> to vector<10x1xf32>
    %c1_119 = arith.constant 1 : index
    %c4_120 = arith.constant 4 : index
    %c0_121 = arith.constant 0 : index
    %c0_122 = arith.constant 0 : index
    %225 = vector.load %arg4[%c1_119, %c4_120, %c0_121, %c0_122] : memref<2x5x32x32xf32, #tpu.memory_space<vmem>>, vector<1x1x32x32xf32>
    %226 = vector.shape_cast %225 : vector<1x1x32x32xf32> to vector<32x32xf32>
    %cst_123 = arith.constant dense<0.000000e+00> : vector<10x32xf32>
    %227 = tpu.matmul %184, %226, %cst_123 {dimension_numbers = #tpu.dot_dimension_numbers<[1], [0], [0], [1], [0, 0, 1, 1], [], []>} : vector<10x32xf32>, vector<32x32xf32>, vector<10x32xf32> -> vector<10x32xf32>
    %228 = vector.broadcast %224 : vector<10x1xf32> to vector<10x32xf32>
    %229 = arith.mulf %228, %227 : vector<10x32xf32>
    %230 = arith.addf %223, %229 : vector<10x32xf32>
    %231 = vector.shape_cast %230 : vector<10x32xf32> to vector<2x5x32xf32>
    %232 = vector.shape_cast %192 : vector<10x32xf32> to vector<2x5x32xf32>
    %233 = vector.shape_cast %193 : vector<10x32xf32> to vector<2x5x32xf32>
    %234 = tpu.transpose %232, [0, 2, 1] : vector<2x5x32xf32> -> vector<2x32x5xf32>
    %235 = vector.extract_strided_slice %231 {offsets = [0, 0, 0], sizes = [2, 5, 8], strides = [1, 1, 1]} : vector<2x5x32xf32> to vector<2x5x8xf32>
    %236 = vector.extract_strided_slice %234 {offsets = [0, 0, 0], sizes = [2, 8, 5], strides = [1, 1, 1]} : vector<2x32x5xf32> to vector<2x8x5xf32>
    %237 = vector.extract_strided_slice %233 {offsets = [0, 0, 0], sizes = [2, 5, 8], strides = [1, 1, 1]} : vector<2x5x32xf32> to vector<2x5x8xf32>
    "tpu.trace_start"() <{level = 10 : i32, message = "bqd,bdk->bqk"}> : () -> ()
    %cst_124 = arith.constant dense<0.000000e+00> : vector<2x5x5xf32>
    %238 = tpu.matmul %235, %236, %cst_124 {dimension_numbers = #tpu.dot_dimension_numbers<[2], [1], [1], [2], [0, 0, 0, 1, 1, 2], [0], [0]>} : vector<2x5x8xf32>, vector<2x8x5xf32>, vector<2x5x5xf32> -> vector<2x5x5xf32>
    "tpu.trace_stop"() : () -> ()
    %cst_125 = arith.constant 0.353553385 : f32
    %239 = vector.broadcast %cst_125 : f32 to vector<2x5x5xf32>
    %240 = arith.mulf %238, %239 : vector<2x5x5xf32>
    %cst_126 = arith.constant dense<0xFF800000> : vector<2x5xf32>
    %241 = vector.multi_reduction <maximumf>, %240, %cst_126 [2] : vector<2x5x5xf32> to vector<2x5xf32>
    %242 = vector.shape_cast %241 : vector<2x5xf32> to vector<2x5x1xf32>
    %243 = vector.broadcast %242 : vector<2x5x1xf32> to vector<2x5x5xf32>
    %244 = arith.subf %240, %243 : vector<2x5x5xf32>
    %245 = math.exp %244 : vector<2x5x5xf32>
    %cst_127 = arith.constant dense<0.000000e+00> : vector<2x5xf32>
    %246 = vector.multi_reduction <add>, %245, %cst_127 [2] : vector<2x5x5xf32> to vector<2x5xf32>
    %247 = vector.shape_cast %246 : vector<2x5xf32> to vector<2x5x1xf32>
    %248 = tpu.reciprocal %247 {approx = true} : vector<2x5x1xf32> -> vector<2x5x1xf32>
    %249 = vector.broadcast %248 : vector<2x5x1xf32> to vector<2x5x5xf32>
    %250 = arith.mulf %245, %249 : vector<2x5x5xf32>
    "tpu.trace_start"() <{level = 10 : i32, message = "bqk,bkd->bqd"}> : () -> ()
    %cst_128 = arith.constant dense<0.000000e+00> : vector<2x5x8xf32>
    %251 = tpu.matmul %250, %237, %cst_128 {dimension_numbers = #tpu.dot_dimension_numbers<[2], [1], [1], [2], [0, 0, 0, 1, 1, 2], [0], [0]>} : vector<2x5x5xf32>, vector<2x5x8xf32>, vector<2x5x8xf32> -> vector<2x5x8xf32>
    "tpu.trace_stop"() : () -> ()
    %252 = vector.extract_strided_slice %231 {offsets = [0, 0, 8], sizes = [2, 5, 8], strides = [1, 1, 1]} : vector<2x5x32xf32> to vector<2x5x8xf32>
    %253 = vector.extract_strided_slice %234 {offsets = [0, 8, 0], sizes = [2, 8, 5], strides = [1, 1, 1]} : vector<2x32x5xf32> to vector<2x8x5xf32>
    %254 = vector.extract_strided_slice %233 {offsets = [0, 0, 8], sizes = [2, 5, 8], strides = [1, 1, 1]} : vector<2x5x32xf32> to vector<2x5x8xf32>
    "tpu.trace_start"() <{level = 10 : i32, message = "bqd,bdk->bqk"}> : () -> ()
    %cst_129 = arith.constant dense<0.000000e+00> : vector<2x5x5xf32>
    %255 = tpu.matmul %252, %253, %cst_129 {dimension_numbers = #tpu.dot_dimension_numbers<[2], [1], [1], [2], [0, 0, 0, 1, 1, 2], [0], [0]>} : vector<2x5x8xf32>, vector<2x8x5xf32>, vector<2x5x5xf32> -> vector<2x5x5xf32>
    "tpu.trace_stop"() : () -> ()
    %cst_130 = arith.constant 0.353553385 : f32
    %256 = vector.broadcast %cst_130 : f32 to vector<2x5x5xf32>
    %257 = arith.mulf %255, %256 : vector<2x5x5xf32>
    %cst_131 = arith.constant dense<0xFF800000> : vector<2x5xf32>
    %258 = vector.multi_reduction <maximumf>, %257, %cst_131 [2] : vector<2x5x5xf32> to vector<2x5xf32>
    %259 = vector.shape_cast %258 : vector<2x5xf32> to vector<2x5x1xf32>
    %260 = vector.broadcast %259 : vector<2x5x1xf32> to vector<2x5x5xf32>
    %261 = arith.subf %257, %260 : vector<2x5x5xf32>
    %262 = math.exp %261 : vector<2x5x5xf32>
    %cst_132 = arith.constant dense<0.000000e+00> : vector<2x5xf32>
    %263 = vector.multi_reduction <add>, %262, %cst_132 [2] : vector<2x5x5xf32> to vector<2x5xf32>
    %264 = vector.shape_cast %263 : vector<2x5xf32> to vector<2x5x1xf32>
    %265 = tpu.reciprocal %264 {approx = true} : vector<2x5x1xf32> -> vector<2x5x1xf32>
    %266 = vector.broadcast %265 : vector<2x5x1xf32> to vector<2x5x5xf32>
    %267 = arith.mulf %262, %266 : vector<2x5x5xf32>
    "tpu.trace_start"() <{level = 10 : i32, message = "bqk,bkd->bqd"}> : () -> ()
    %cst_133 = arith.constant dense<0.000000e+00> : vector<2x5x8xf32>
    %268 = tpu.matmul %267, %254, %cst_133 {dimension_numbers = #tpu.dot_dimension_numbers<[2], [1], [1], [2], [0, 0, 0, 1, 1, 2], [0], [0]>} : vector<2x5x5xf32>, vector<2x5x8xf32>, vector<2x5x8xf32> -> vector<2x5x8xf32>
    "tpu.trace_stop"() : () -> ()
    %269 = vector.extract_strided_slice %231 {offsets = [0, 0, 16], sizes = [2, 5, 8], strides = [1, 1, 1]} : vector<2x5x32xf32> to vector<2x5x8xf32>
    %270 = vector.extract_strided_slice %234 {offsets = [0, 16, 0], sizes = [2, 8, 5], strides = [1, 1, 1]} : vector<2x32x5xf32> to vector<2x8x5xf32>
    %271 = vector.extract_strided_slice %233 {offsets = [0, 0, 16], sizes = [2, 5, 8], strides = [1, 1, 1]} : vector<2x5x32xf32> to vector<2x5x8xf32>
    "tpu.trace_start"() <{level = 10 : i32, message = "bqd,bdk->bqk"}> : () -> ()
    %cst_134 = arith.constant dense<0.000000e+00> : vector<2x5x5xf32>
    %272 = tpu.matmul %269, %270, %cst_134 {dimension_numbers = #tpu.dot_dimension_numbers<[2], [1], [1], [2], [0, 0, 0, 1, 1, 2], [0], [0]>} : vector<2x5x8xf32>, vector<2x8x5xf32>, vector<2x5x5xf32> -> vector<2x5x5xf32>
    "tpu.trace_stop"() : () -> ()
    %cst_135 = arith.constant 0.353553385 : f32
    %273 = vector.broadcast %cst_135 : f32 to vector<2x5x5xf32>
    %274 = arith.mulf %272, %273 : vector<2x5x5xf32>
    %cst_136 = arith.constant dense<0xFF800000> : vector<2x5xf32>
    %275 = vector.multi_reduction <maximumf>, %274, %cst_136 [2] : vector<2x5x5xf32> to vector<2x5xf32>
    %276 = vector.shape_cast %275 : vector<2x5xf32> to vector<2x5x1xf32>
    %277 = vector.broadcast %276 : vector<2x5x1xf32> to vector<2x5x5xf32>
    %278 = arith.subf %274, %277 : vector<2x5x5xf32>
    %279 = math.exp %278 : vector<2x5x5xf32>
    %cst_137 = arith.constant dense<0.000000e+00> : vector<2x5xf32>
    %280 = vector.multi_reduction <add>, %279, %cst_137 [2] : vector<2x5x5xf32> to vector<2x5xf32>
    %281 = vector.shape_cast %280 : vector<2x5xf32> to vector<2x5x1xf32>
    %282 = tpu.reciprocal %281 {approx = true} : vector<2x5x1xf32> -> vector<2x5x1xf32>
    %283 = vector.broadcast %282 : vector<2x5x1xf32> to vector<2x5x5xf32>
    %284 = arith.mulf %279, %283 : vector<2x5x5xf32>
    "tpu.trace_start"() <{level = 10 : i32, message = "bqk,bkd->bqd"}> : () -> ()
    %cst_138 = arith.constant dense<0.000000e+00> : vector<2x5x8xf32>
    %285 = tpu.matmul %284, %271, %cst_138 {dimension_numbers = #tpu.dot_dimension_numbers<[2], [1], [1], [2], [0, 0, 0, 1, 1, 2], [0], [0]>} : vector<2x5x5xf32>, vector<2x5x8xf32>, vector<2x5x8xf32> -> vector<2x5x8xf32>
    "tpu.trace_stop"() : () -> ()
    %286 = vector.extract_strided_slice %231 {offsets = [0, 0, 24], sizes = [2, 5, 8], strides = [1, 1, 1]} : vector<2x5x32xf32> to vector<2x5x8xf32>
    %287 = vector.extract_strided_slice %234 {offsets = [0, 24, 0], sizes = [2, 8, 5], strides = [1, 1, 1]} : vector<2x32x5xf32> to vector<2x8x5xf32>
    %288 = vector.extract_strided_slice %233 {offsets = [0, 0, 24], sizes = [2, 5, 8], strides = [1, 1, 1]} : vector<2x5x32xf32> to vector<2x5x8xf32>
    "tpu.trace_start"() <{level = 10 : i32, message = "bqd,bdk->bqk"}> : () -> ()
    %cst_139 = arith.constant dense<0.000000e+00> : vector<2x5x5xf32>
    %289 = tpu.matmul %286, %287, %cst_139 {dimension_numbers = #tpu.dot_dimension_numbers<[2], [1], [1], [2], [0, 0, 0, 1, 1, 2], [0], [0]>} : vector<2x5x8xf32>, vector<2x8x5xf32>, vector<2x5x5xf32> -> vector<2x5x5xf32>
    "tpu.trace_stop"() : () -> ()
    %cst_140 = arith.constant 0.353553385 : f32
    %290 = vector.broadcast %cst_140 : f32 to vector<2x5x5xf32>
    %291 = arith.mulf %289, %290 : vector<2x5x5xf32>
    %cst_141 = arith.constant dense<0xFF800000> : vector<2x5xf32>
    %292 = vector.multi_reduction <maximumf>, %291, %cst_141 [2] : vector<2x5x5xf32> to vector<2x5xf32>
    %293 = vector.shape_cast %292 : vector<2x5xf32> to vector<2x5x1xf32>
    %294 = vector.broadcast %293 : vector<2x5x1xf32> to vector<2x5x5xf32>
    %295 = arith.subf %291, %294 : vector<2x5x5xf32>
    %296 = math.exp %295 : vector<2x5x5xf32>
    %cst_142 = arith.constant dense<0.000000e+00> : vector<2x5xf32>
    %297 = vector.multi_reduction <add>, %296, %cst_142 [2] : vector<2x5x5xf32> to vector<2x5xf32>
    %298 = vector.shape_cast %297 : vector<2x5xf32> to vector<2x5x1xf32>
    %299 = tpu.reciprocal %298 {approx = true} : vector<2x5x1xf32> -> vector<2x5x1xf32>
    %300 = vector.broadcast %299 : vector<2x5x1xf32> to vector<2x5x5xf32>
    %301 = arith.mulf %296, %300 : vector<2x5x5xf32>
    "tpu.trace_start"() <{level = 10 : i32, message = "bqk,bkd->bqd"}> : () -> ()
    %cst_143 = arith.constant dense<0.000000e+00> : vector<2x5x8xf32>
    %302 = tpu.matmul %301, %288, %cst_143 {dimension_numbers = #tpu.dot_dimension_numbers<[2], [1], [1], [2], [0, 0, 0, 1, 1, 2], [0], [0]>} : vector<2x5x5xf32>, vector<2x5x8xf32>, vector<2x5x8xf32> -> vector<2x5x8xf32>
    "tpu.trace_stop"() : () -> ()
    %303 = tpu.concatenate %251, %268, %285, %302 in 2 : vector<2x5x8xf32>, vector<2x5x8xf32>, vector<2x5x8xf32>, vector<2x5x8xf32> -> vector<2x5x32xf32>
    %304 = vector.shape_cast %303 : vector<2x5x32xf32> to vector<10x32xf32>
    %c1_144 = arith.constant 1 : index
    %c0_145 = arith.constant 0 : index
    %c0_146 = arith.constant 0 : index
    %305 = vector.load %arg8[%c1_144, %c0_145, %c0_146] : memref<2x32x32xf32, #tpu.memory_space<vmem>>, vector<1x32x32xf32>
    %306 = vector.shape_cast %305 : vector<1x32x32xf32> to vector<32x32xf32>
    %cst_147 = arith.constant dense<0.000000e+00> : vector<10x32xf32>
    %307 = tpu.matmul %304, %306, %cst_147 {dimension_numbers = #tpu.dot_dimension_numbers<[1], [0], [0], [1], [0, 0, 1, 1], [], []>} : vector<10x32xf32>, vector<32x32xf32>, vector<10x32xf32> -> vector<10x32xf32>
    %c1_148 = arith.constant 1 : index
    %c0_149 = arith.constant 0 : index
    %c0_150 = arith.constant 0 : index
    %308 = vector.load %arg9[%c1_148, %c0_149, %c0_150] : memref<2x1x32xf32, #tpu.memory_space<vmem>>, vector<1x1x32xf32>
    %309 = vector.shape_cast %308 : vector<1x1x32xf32> to vector<1x32xf32>
    %310 = vector.broadcast %309 : vector<1x32xf32> to vector<10x32xf32>
    %311 = arith.addf %307, %310 : vector<10x32xf32>
    %312 = arith.addf %184, %311 : vector<10x32xf32>
    %cst_151 = arith.constant dense<0.000000e+00> : vector<10xf32>
    %313 = vector.multi_reduction <add>, %312, %cst_151 [1] : vector<10x32xf32> to vector<10xf32>
    %314 = vector.shape_cast %313 : vector<10xf32> to vector<10x1xf32>
    %cst_152 = arith.constant 3.200000e+01 : f32
    %315 = vector.broadcast %cst_152 : f32 to vector<10x1xf32>
    %316 = arith.divf %314, %315 : vector<10x1xf32>
    %317 = vector.broadcast %316 : vector<10x1xf32> to vector<10x32xf32>
    %318 = arith.subf %312, %317 : vector<10x32xf32>
    %319 = arith.mulf %318, %318 : vector<10x32xf32>
    %cst_153 = arith.constant dense<0.000000e+00> : vector<10xf32>
    %320 = vector.multi_reduction <add>, %319, %cst_153 [1] : vector<10x32xf32> to vector<10xf32>
    %321 = vector.shape_cast %320 : vector<10xf32> to vector<10x1xf32>
    %cst_154 = arith.constant 3.200000e+01 : f32
    %322 = vector.broadcast %cst_154 : f32 to vector<10x1xf32>
    %323 = arith.divf %321, %322 : vector<10x1xf32>
    %324 = vector.broadcast %316 : vector<10x1xf32> to vector<10x32xf32>
    %325 = arith.subf %312, %324 : vector<10x32xf32>
    %cst_155 = arith.constant 9.99999974E-6 : f32
    %326 = vector.broadcast %cst_155 : f32 to vector<10x1xf32>
    %327 = arith.addf %323, %326 : vector<10x1xf32>
    %328 = math.rsqrt %327 : vector<10x1xf32>
    %329 = vector.broadcast %328 : vector<10x1xf32> to vector<10x32xf32>
    %330 = arith.mulf %325, %329 : vector<10x32xf32>
    %c1_156 = arith.constant 1 : index
    %c0_157 = arith.constant 0 : index
    %c0_158 = arith.constant 0 : index
    %331 = vector.load %arg10[%c1_156, %c0_157, %c0_158] : memref<2x1x32xf32, #tpu.memory_space<vmem>>, vector<1x1x32xf32>
    %332 = vector.shape_cast %331 : vector<1x1x32xf32> to vector<1x32xf32>
    %333 = vector.broadcast %332 : vector<1x32xf32> to vector<10x32xf32>
    %334 = arith.mulf %330, %333 : vector<10x32xf32>
    %c1_159 = arith.constant 1 : index
    %c0_160 = arith.constant 0 : index
    %c0_161 = arith.constant 0 : index
    %335 = vector.load %arg11[%c1_159, %c0_160, %c0_161] : memref<2x1x32xf32, #tpu.memory_space<vmem>>, vector<1x1x32xf32>
    %336 = vector.shape_cast %335 : vector<1x1x32xf32> to vector<1x32xf32>
    %337 = vector.broadcast %336 : vector<1x32xf32> to vector<10x32xf32>
    %338 = arith.addf %334, %337 : vector<10x32xf32>
    %c0_162 = arith.constant 0 : index
    %c0_163 = arith.constant 0 : index
    %339 = vector.load %arg12[%c0_162, %c0_163] : memref<10x32xf32, #tpu.memory_space<vmem>>, vector<10x32xf32>
    tpu.vector_store %arg12[%c0_162, %c0_163], %338 {strides = array<i32>} : memref<10x32xf32, #tpu.memory_space<vmem>>, vector<10x32xf32>,
    return
  }
}

</mosaic_0001>

<bundles_post_ra>
// kernel: tpu_custom_call.1
= control target key start
LH: loop header
LB: loop body
LE: loop exit
PB: predicated region body
PF: predicated region fallthrough
CT: control target
= control target key end

     0   :  { %17 = vsyncpa [#allocation3], 0  ;;  %s7080_s0 = inlined_call_operand.hbm [shape: f32[10,16], index: 0, kind: input, shape index: {}]   ;;  %s7081_s1 = inlined_call_operand.vmem [shape: f32[10,5], index: 1, kind: input, shape index: {}]   ;;  %s7082_s2 = inlined_call_operand.vmem [shape: f32[4,16,32], index: 2, kind: input, shape index: {}]   ;;  %s7083_s3 = inlined_call_operand.hbm [shape: f32[10,32], index: 3, kind: input, shape index: {}]   ;;  %s7084_s4 = inlined_call_operand.hbm [shape: f32[2,5,32,32], index: 4, kind: input, shape index: {}]   ;;  %s7085_s5 = inlined_call_operand.vmem [shape: f32[2,10,32], index: 5, kind: input, shape index: {}]   ;;  %s7086_s6 = inlined_call_operand.hbm [shape: f32[2,32,64], index: 6, kind: input, shape index: {}]   ;;  %s7087_s7 = inlined_call_operand.vmem [shape: f32[2,1,64], index: 7, kind: input, shape index: {}]   ;;  %s7088_s8 = inlined_call_operand.hbm [shape: f32[2,32,32], index: 8, kind: input, shape index: {}]   ;;  %s7089_s9 = inlined_call_operand.vmem [shape: f32[2,1,32], index: 9, kind: input, shape index: {}]   ;;  %s7090_s10 = inlined_call_operand.vmem [shape: f32[2,1,32], index: 10, kind: input, shape index: {}]   ;;  %s7091_s11 = inlined_call_operand.vmem [shape: f32[2,1,32], index: 11, kind: input, shape index: {}]   ;;  %s7092_s12 = inlined_call_operand.hbm [shape: f32[10,32], index: 12, kind: output, shape index: {}]  }
   0x1   :  { %18 = vsyncpa [#allocation6], 0 }
   0x2   :  { %19 = vsyncpa [#allocation9], 0 }
   0x3   :  { %20 = vsyncpa [#allocation4], 0  ;;  %s6300_s21 = smov [#allocation5]   ;;  %s6301_s23 = smov [#allocation8]  }
   0x4   :  { %s42_s22 = sshll.u32 %s6300_s21, 4  ;;  %s68_s24 = sshll.u32 %s6301_s23, 4  ;;  %s43_s22 = int_to_ptr.vmem [resolvable:$true] %s42_s22  ;;  %s69_s24 = int_to_ptr.vmem [resolvable:$true] %s68_s24 }
   0x5   :  { %s6180_s25 = scalar_lea.vmem %s43_s22, 256  ;;  %p6185_p1 = scmp.lt.s32.totalorder %s43_s22, %s43_s22 }
   0x6   :  { %p6181_p0 = scmp.ne.s32.totalorder %s43_s22, %s6180_s25  ;;  %p6186_p2 = scmp.lt.s32.totalorder %s6180_s25, %s6180_s25 }
   0x8   :  { %p6187_p3 = por %p6186_p2, %p6185_p1 }
   0xa   :  { %p6188_p4 = pnand %p6187_p3, %p6181_p0 }
   0xc   :  { %6191 = shalt.err (!%p6188_p4)
}
   0xd   :  { %s6302_s26 = smov 128   ;;  %s6303_s27 = smov 8  }
   0xe   :  { %48 = dma.hbm_to_vmem [thread:$0]  %s7083_s3, 256, %s43_s22, [#allocation6], %s6302_s26, %s6302_s26, %s6303_s27  }
   0xf   :  { %s6200_s30 = scalar_lea.vmem %s69_s24, 1024  ;;  %p6205_p6 = scmp.lt.s32.totalorder %s69_s24, %s69_s24 }
  0x10   :  { %p6201_p5 = scmp.ne.s32.totalorder %s69_s24, %s6200_s30  ;;  %p6206_p7 = scmp.lt.s32.totalorder %s6200_s30, %s6200_s30 }
  0x12   :  { %p6207_p8 = por %p6206_p7, %p6205_p6 }
  0x14   :  { %p6208_p9 = pnand %p6207_p8, %p6201_p5 }
  0x16   :  { %6211 = shalt.err (!%p6208_p9)
}
  0x17   :  { %74 = dma.hbm_to_vmem [thread:$0]  %s7086_s6, 1024, %s69_s24, [#allocation9], %s6302_s26, %s6302_s26, %s6303_s27  }
  0x18   :  { %s6304_s15 = smov [#allocation2]   ;;  %s6305_s17 = smov [#allocation7]  }
  0x19   :  { %s26_s16 = sshll.u32 %s6304_s15, 4  ;;  %s54_s18 = sshll.u32 %s6305_s17, 4  ;;  %s27_s16 = int_to_ptr.vmem [resolvable:$true] %s26_s16  ;;  %s55_s18 = int_to_ptr.vmem [resolvable:$true] %s54_s18 }
  0x1a   :  { %s6220_s3 = scalar_lea.vmem %s27_s16, 256  ;;  %p6225_p11 = scmp.lt.s32.totalorder %s27_s16, %s27_s16 }
  0x1b   :  { %p6221_p10 = scmp.ne.s32.totalorder %s27_s16, %s6220_s3  ;;  %p6226_p12 = scmp.lt.s32.totalorder %s6220_s3, %s6220_s3 }
  0x1d   :  { %p6227_p13 = por %p6226_p12, %p6225_p11 }
  0x1f   :  { %p6228_p0 = pnand %p6227_p13, %p6221_p10 }
  0x21   :  { %6231 = shalt.err (!%p6228_p0)
}
  0x22   :  { %32 = dma.hbm_to_vmem [thread:$0]  %s7080_s0, 256, %s27_s16, [#allocation3], %s6302_s26, %s6302_s26, %s6303_s27  }
  0x23   :  { %s6240_s6 = scalar_lea.vmem %s55_s18, 5120  ;;  %p6245_p2 = scmp.lt.s32.totalorder %s55_s18, %s55_s18 }
  0x24   :  { %p6241_p1 = scmp.ne.s32.totalorder %s55_s18, %s6240_s6  ;;  %p6246_p3 = scmp.lt.s32.totalorder %s6240_s6, %s6240_s6 }
  0x26   :  { %p6247_p4 = por %p6246_p3, %p6245_p2 }
  0x28   :  { %p6248_p5 = pnand %p6247_p4, %p6241_p1 }
  0x2a   :  { %6251 = shalt.err (!%p6248_p5)
}
  0x2b   :  { %60 = dma.hbm_to_vmem [thread:$0]  %s7084_s4, 5120, %s55_s18, [#allocation6], %s6302_s26, %s6302_s26, %s6303_s27  }
  0x2c   :  { %s6306_s23 = smov [#allocation10]  }
  0x2d   :  { %s82_s24 = sshll.u32 %s6306_s23, 4  ;;  %s83_s24 = int_to_ptr.vmem [resolvable:$true] %s82_s24 }
  0x2e   :  { %s6260_s25 = scalar_lea.vmem %s83_s24, 1024  ;;  %p6265_p7 = scmp.lt.s32.totalorder %s83_s24, %s83_s24 }
  0x2f   :  { %p6261_p6 = scmp.ne.s32.totalorder %s83_s24, %s6260_s25  ;;  %p6266_p8 = scmp.lt.s32.totalorder %s6260_s25, %s6260_s25 }
  0x31   :  { %p6267_p9 = por %p6266_p8, %p6265_p7 }
  0x33   :  { %p6268_p10 = pnand %p6267_p9, %p6261_p6 }
  0x35   :  { %6271 = shalt.err (!%p6268_p10)
}
  0x36   :  { %88 = dma.hbm_to_vmem [thread:$0]  %s7088_s8, 1024, %s83_s24, [#allocation9], %s6302_s26, %s6302_s26, %s6303_s27  }
  0x37   :  { %6292 = dma.done.wait [#allocation3], 256  }
  0x38   :  { %6293 = vsyncadd [#allocation3], 4294967040 }
  0x39   :  { %6294 = dma.done.wait [#allocation6], 5376  }
  0x3a   :  { %6295 = vsyncadd [#allocation6], 4294961920 }
  0x3b   :  { %6296 = dma.done.wait [#allocation9], 2048  }
  0x3c   :  { %6297 = vsyncadd [#allocation9], 4294965248  ;;  %v6307_v0 = vmov 2   ;;  %v6308_v1 = vmov 1   ;;  %vm118_vm0 = vcmask 130048   ;;  %v117_v2 = vld [vmem:[%s7082_s2 + $0x8] sm:$0xff] }
  0x3d   :  { %6093 = vset.pattern.permute.xlu1 %v6307_v0  ;;  %6092 = vset.pattern.permute.xlu0 %v6308_v1  ;;  %v116_v3 = vld [vmem:[%s7082_s2] sm:$0xff]  ;;  %v5442_v5 = vld [vmem:[%s7082_s2 + $0x28] sm:$0xff]  ;;  %v5438_v7 = vld [vmem:[%s7082_s2 + $0x18] sm:$0xff]  ;;  %v6309_v14 = vmov 3   ;;  %v6310_v15 = vmov 4   ;;  %v6311_v26 = vmov 0  }
  0x3e   :  { %v110_v4 = vld [vmem:[#allocation2] sm:$0xff]  ;;  %5725 = vmatprep.subr.mxu1 %v117_v2  ;;  %v111_v6 = vld [vmem:[#allocation2 + $0x8] sm:$0x3]  ;;  %5739 = vmatprep.subr.mxu0 %v5442_v5  ;;  %v5437_v9 = vld [vmem:[%s7082_s2 + $0x10] sm:$0xff]  ;;  %vm495_vm1 = vcmask 261120   ;;  %vm6313_vm2 = vmmov 0  }
  0x3f   :  { %5729 = vmatprep.mubr.msk.f32.mxu1 %vm118_vm0, %v110_v4  ;;  %5726 = vmatpush3.msra.mxu1 %v117_v2  ;;  %v5441_v8 = vld [vmem:[%s7082_s2 + $0x20] sm:$0xff]  ;;  %v5446_v10 = vld [vmem:[%s7082_s2 + $0x38] sm:$0xff]  ;;  %v5445_v11 = vld [vmem:[%s7082_s2 + $0x30] sm:$0xff]  ;;  %vm1230_vm3 = vcmask 64512   ;;  %vm1459_vm4 = vcmask 36864   ;;  %s6315_s13 = smov 96  }
  0x40   :  { %5727 = vmatprep.subr.mxu1 %v116_v3  ;;  %5740 = vmatpush3.msra.mxu0 %v5442_v5  ;;  %v112_v12 = vld [vmem:[%s7081_s1] sm:$0xff]  ;;  %v113_v13 = vld [vmem:[%s7081_s1 + $0x8] sm:$0x3]  ;;  %v487_v16 = vld [vmem:[#allocation8 + $0x18] sm:$0xff]  ;;  %s6316_s8 = smov 120   ;;  %vm1488_vm5 = vcmask 1044480  }
  0x41   :  { %5728 = vmatpush3.msra.mxu1 %v116_v3  ;;  %5741 = vmatprep.subr.mxu0 %v5441_v8  ;;  %v582_v17 = vld [vmem:[#allocation7 + $0x18] sm:$0xff]  ;;  %v486_v18 = vld [vmem:[#allocation8 + $0x10] sm:$0xff]  ;;  %v485_v20 = vld [vmem:[#allocation8 + $0x8] sm:$0xff]  ;;  %vm1484_vm6 = vcmask 39936   ;;  %s6317_s14 = smov 88   ;;  %s6318_s15 = smov 112  }
  0x42   :  { %5730 = vmatmul.mubr.msk.f32.vlgmr.msra.gmra.mxu1 %vm118_vm0, %v111_v6  ;;  %5732 = vmatprep.subr.mxu1 %v5438_v7  ;;  %v581_v19 = vld [vmem:[#allocation7 + $0x10] sm:$0xff]  ;;  %v580_v21 = vld [vmem:[#allocation7 + $0x8] sm:$0xff]  ;;  %v484_v22 = vld [vmem:[#allocation8] sm:$0xff]  ;;  %s6319_s16 = smov 80   ;;  %s6320_s17 = smov 104   ;;  %vm2668_vm7 = vcmask 195584  }
  0x43   :  { %5733 = vmatpush3.msra.mxu1 %v5438_v7  ;;  %5736 = vmatprep.mubr.msk.f32.mxu1 %vm118_vm0, %v110_v4  ;;  %v579_v23 = vld [vmem:[#allocation7] sm:$0xff]  ;;  %v674_v24 = vld [vmem:[#allocation7 + $0x38] sm:$0xff]  ;;  %v114_v38 = vld [vmem:[#allocation5] sm:$0xff]  ;;  %s6321_s18 = smov 72   ;;  %s6322_s3 = smov 16   ;;  %vm2910_vm8 = vcmask 254976  }
  0x44   :  { %5734 = vmatprep.subr.mxu1 %v5437_v9  ;;  %5742 = vmatpush3.msra.mxu0 %v5441_v8  ;;  %v758_v25 = vld [vmem:[#allocation7 + $0x58] sm:$0xff]  ;;  %v673_v61 = vld [vmem:[#allocation7 + $0x30] sm:$0xff]  ;;  %v672_v63 = vld [vmem:[#allocation7 + $0x28] sm:$0xff]  ;;  %s6323_s19 = smov 24  }
  0x45   :  { %5735 = vmatpush3.msra.mxu1 %v5437_v9  ;;  %5743 = vmatprep.mubr.msk.f32.mxu0 %vm118_vm0, %v110_v4  ;;  %v115_v34 = vld [vmem:[#allocation5 + $0x8] sm:$0x3]  ;;  %v757_v62 = vld [vmem:[#allocation7 + $0x50] sm:$0xff]  ;;  %v756_v0 = vld [vmem:[#allocation7 + $0x48] sm:$0xff] }
  0x46   :  { %5737 = vmatmul.mubr.msk.f32.vlgmr.msra.gmra.mxu1 %vm118_vm0, %v111_v6  ;;  %5746 = vmatprep.subr.mxu1 %v5446_v10  ;;  %v671_v1 = vld [vmem:[#allocation7 + $0x20] sm:$0xff]  ;;  %v842_v3 = vld [vmem:[#allocation7 + $0x78] sm:$0xff]  ;;  %v841_v5 = vld [vmem:[#allocation7 + $0x70] sm:$0xff] }
  0x47   :  { %5744 = vmatmul.mubr.msk.f32.vlgmr.msra.gmra.mxu0 %vm118_vm0, %v111_v6  ;;  %5747 = vmatpush3.msra.mxu1 %v5446_v10  ;;  %v755_v2 = vld [vmem:[#allocation7 + $0x40] sm:$0xff]  ;;  %v840_v7 = vld [vmem:[#allocation7 + $0x68] sm:$0xff] }
  0x48   :  { %5748 = vmatprep.subr.mxu1 %v5445_v11  ;;  %5750 = vmatprep.mubr.msk.f32.mxu1 %vm118_vm0, %v110_v4  ;;  %v926_v4 = vld [vmem:[#allocation7 + $0x98] sm:$0xff]  ;;  %v924_v8 = vld [vmem:[#allocation7 + $0x88] sm:$0xff]  ;;  %v839_v9 = vld [vmem:[#allocation7 + $0x60] sm:$0xff] }
  0x49   :  { %5749 = vmatpush3.msra.mxu1 %v5445_v11  ;;  %293 = vperm.xlu1 %6093, %v112_v12   ;;  %v923_v10 = vld [vmem:[#allocation7 + $0x80] sm:$0xff]  ;;  %v6312_v11 = vmov 0.0  }
  0x4a   :  { %5751 = vmatmul.mubr.msk.f32.vlgmr.msra.gmra.mxu1 %vm118_vm0, %v111_v6  ;;  %202 = vperm.xlu0 %6092, %v112_v12   ;;  %v925_v6 = vld [vmem:[#allocation7 + $0x90] sm:$0xff] }
  0x4b   :  { %5753 = vmatprep.subr.mxu0 %v487_v16  ;;  %5764 = vmatprep.subr.mxu1 %v582_v17 }
  0x4c   :  { %5754 = vmatpush3.msra.mxu0 %v487_v16  ;;  %5765 = vmatpush3.msra.mxu1 %v582_v17  ;;  %v5449_v17 = vld [vmem:[%s7087_s7] ss:$0 sm:$0xff] }
  0x4d   :  { %297 = vperm.xlu1 %6093, %v113_v13   ;;  %5755 = vmatprep.subr.mxu0 %v486_v18 }
  0x4e   :  { %207 = vperm.xlu0 %6092, %v113_v13   ;;  %5766 = vmatprep.subr.mxu1 %v581_v19 }
  0x4f   :  { %5756 = vmatpush3.msra.mxu0 %v486_v18  ;;  %5767 = vmatpush3.msra.mxu1 %v581_v19 }
  0x50   :  { %5757 = vmatprep.subr.mxu0 %v485_v20  ;;  %5768 = vmatprep.subr.mxu1 %v580_v21 }
  0x51   :  { %6095 = vset.pattern.permute.xlu1 %v6309_v14  ;;  %5758 = vmatpush3.msra.mxu0 %v485_v20 }
  0x52   :  { %6094 = vset.pattern.permute.xlu0 %v6309_v14  ;;  %387 = vperm.xlu1 %6095, %v113_v13   ;;  %v1012_v14 = vlaneseq }
  0x53   :  { %383 = vperm.xlu0 %6094, %v112_v12   ;;  %5769 = vmatpush3.msra.mxu1 %v580_v21 }
  0x54   :  { %5759 = vmatprep.subr.mxu0 %v484_v22  ;;  %5770 = vmatprep.subr.mxu1 %v579_v23  ;;  %v1013_v16 = vshrl.u32 %v1012_v14, 7 }
  0x55   :  { %5760 = vmatpush3.msra.mxu0 %v484_v22  ;;  %5771 = vmatpush3.msra.mxu1 %v579_v23 }
  0x56   :  { %6096 = vset.pattern.permute.xlu1 %v6310_v15  ;;  %5775 = vmatprep.subr.mxu0 %v674_v24 }
  0x57   :  { %6097 = vset.pattern.permute.xlu0 %v6310_v15  ;;  %473 = vperm.xlu1 %6096, %v112_v12  }
  0x58   :  { %477 = vperm.xlu0 %6097, %v113_v13   ;;  %5786 = vmatprep.subr.mxu1 %v758_v25 }
  0x5b   :  { %6098 = vset.pattern.permute.xlu1 %v6311_v26 }
  0x5c   :  { %6099 = vset.pattern.permute.xlu0 %v6311_v26  ;;  %659 = vperm.xlu1 %6098, %v112_v12   ;;  %v6314_v12 = vmov 1966171168  }
  0x60   :  { %663 = vperm.xlu1 %6098, %v113_v13   ;;  %v1010_v13 = vunpack.c.l.s4 %v6314_v12 }
  0x62   :  { %v1011_v15 = vunpack.c.0.s8 %v1010_v13 }
  0x64   :  { %v6519_v19 = vsub.s32 %v1011_v15, %v1013_v16 }
  0xc4   :  { %v6460_v28 = vpop.permute.xlu1 %293 }
  0xc5   :  { %v6458_v27 = vpop.permute.xlu0 %202 }
  0xc8   :  { %v6464_v30 = vpop.permute.xlu1 %297 }
  0xc9   :  { %v6462_v29 = vpop.permute.xlu0 %207 }
  0xcd   :  { %v6469_v36 = vpop.permute.xlu1 %387 }
  0xce   :  { %v6467_v33 = vpop.permute.xlu0 %383 }
  0xd2   :  { %v6477_v51 = vpop.permute.xlu1 %473 }
  0xd3   :  { %v6475_v49 = vpop.permute.xlu0 %477 }
  0xd7   :  { %v6521_v20 = vpop.permute.xlu1 %659 }
 0x102   :  { %v5731_v31 = vpop.f32.mrf.mxu1 }
 0x103   :  { %v211_v32 = vmul.f32 %v5731_v31, %v6462_v29 }
 0x104   :  { %v191_v35 = vpop.f32.mrf.mxu1 }
 0x105   :  { %v210_v37 = vmul.f32 %v6458_v27, %v191_v35  ;;  %v213_v40 = vadd.f32 %v211_v32, %v115_v34  ;;  %v6525_v32 = vpop.permute.xlu1 %663 }
 0x106   :  { %v5738_v39 = vpop.f32.mrf.mxu1 }
 0x107   :  { %v301_v41 = vmul.f32 %v5738_v39, %v6464_v30  ;;  %v5745_v42 = vpop.f32.mrf.mxu0  ;;  %v212_v45 = vadd.f32 %v210_v37, %v114_v38 }
 0x108   :  { %v391_v43 = vmul.f32 %v5745_v42, %v6469_v36  ;;  %v283_v44 = vpop.f32.mrf.mxu1 }
 0x109   :  { %v303_v46 = vadd.f32 %v301_v41, %v213_v40  ;;  %v300_v47 = vmul.f32 %v6460_v28, %v283_v44  ;;  %v373_v48 = vpop.f32.mrf.mxu0 }
 0x10a   :  { %v5752_v50 = vpop.f32.mrf.mxu1  ;;  %v390_v53 = vmul.f32 %v6467_v33, %v373_v48 }
 0x10b   :  { %v302_v52 = vadd.f32 %v300_v47, %v212_v45  ;;  %v393_v54 = vadd.f32 %v391_v43, %v303_v46  ;;  %v481_v55 = vmul.f32 %v5752_v50, %v6475_v49  ;;  %v578_v45 = vld [vmem:[%s7085_s5 + $0x8] sm:$0x3] }
 0x10c   :  { %v463_v56 = vpop.f32.mrf.mxu1 }
 0x10d   :  { %v392_v57 = vadd.f32 %v390_v53, %v302_v52  ;;  %v480_v58 = vmul.f32 %v6477_v51, %v463_v56  ;;  %v6484_v60 = vadd.f32 %v481_v55, %v393_v54 }
 0x10f   :  { %v6482_v59 = vadd.f32 %v480_v58, %v392_v57 }
 0x111   :  { %5761 = vmatprep.mubr.msk.f32.mxu0 %vm495_vm1, %v6482_v59  ;;  %5772 = vmatprep.mubr.msk.f32.mxu1 %vm495_vm1, %v6482_v59 }
 0x112   :  { %5762 = vmatmul.mubr.msk.f32.vlgmr.msra.gmra.mxu0 %vm495_vm1, %v6484_v60  ;;  %5773 = vmatmul.mubr.msk.f32.vlgmr.msra.gmra.mxu1 %vm495_vm1, %v6484_v60 }
 0x113   :  { %5776 = vmatpush3.msra.mxu0 %v674_v24  ;;  %5787 = vmatpush3.msra.mxu1 %v758_v25 }
 0x114   :  { %5777 = vmatprep.subr.mxu0 %v673_v61  ;;  %5783 = vmatprep.mubr.msk.f32.mxu0 %vm495_vm1, %v6482_v59 }
 0x115   :  { %5788 = vmatprep.subr.mxu1 %v757_v62  ;;  %5794 = vmatprep.mubr.msk.f32.mxu1 %vm495_vm1, %v6482_v59 }
 0x116   :  { %5778 = vmatpush3.msra.mxu0 %v673_v61  ;;  %5789 = vmatpush3.msra.mxu1 %v757_v62  ;;  %v577_v62 = vld [vmem:[%s7085_s5] sm:$0xff] }
 0x117   :  { %5779 = vmatprep.subr.mxu0 %v672_v63  ;;  %5790 = vmatprep.subr.mxu1 %v756_v0 }
 0x118   :  { %5780 = vmatpush3.msra.mxu0 %v672_v63  ;;  %5791 = vmatpush3.msra.mxu1 %v756_v0 }
 0x119   :  { %5781 = vmatprep.subr.mxu0 %v671_v1  ;;  %5792 = vmatprep.subr.mxu1 %v755_v2 }
 0x11a   :  { %5782 = vmatpush3.msra.mxu0 %v671_v1  ;;  %5793 = vmatpush3.msra.mxu1 %v755_v2 }
 0x11b   :  { %5784 = vmatmul.mubr.msk.f32.vlgmr.msra.gmra.mxu0 %vm495_vm1, %v6484_v60  ;;  %5795 = vmatmul.mubr.msk.f32.vlgmr.msra.gmra.mxu1 %vm495_vm1, %v6484_v60 }
 0x11c   :  { %5797 = vmatprep.subr.mxu0 %v842_v3  ;;  %5808 = vmatprep.subr.mxu1 %v926_v4 }
 0x11d   :  { %5798 = vmatpush3.msra.mxu0 %v842_v3  ;;  %5805 = vmatprep.mubr.msk.f32.mxu0 %vm495_vm1, %v6482_v59 }
 0x11e   :  { %5809 = vmatpush3.msra.mxu1 %v926_v4  ;;  %5816 = vmatprep.mubr.msk.f32.mxu1 %vm495_vm1, %v6482_v59 }
 0x11f   :  { %5799 = vmatprep.subr.mxu0 %v841_v5  ;;  %5810 = vmatprep.subr.mxu1 %v925_v6 }
 0x120   :  { %5800 = vmatpush3.msra.mxu0 %v841_v5  ;;  %5811 = vmatpush3.msra.mxu1 %v925_v6 }
 0x121   :  { %5801 = vmatprep.subr.mxu0 %v840_v7  ;;  %5812 = vmatprep.subr.mxu1 %v924_v8 }
 0x122   :  { %5802 = vmatpush3.msra.mxu0 %v840_v7  ;;  %5813 = vmatpush3.msra.mxu1 %v924_v8 }
 0x123   :  { %5803 = vmatprep.subr.mxu0 %v839_v9  ;;  %5814 = vmatprep.subr.mxu1 %v923_v10 }
 0x124   :  { %5804 = vmatpush3.msra.mxu0 %v839_v9  ;;  %5815 = vmatpush3.msra.mxu1 %v923_v10 }
 0x125   :  { %5806 = vmatmul.mubr.msk.f32.vlgmr.msra.gmra.mxu0 %vm495_vm1, %v6484_v60  ;;  %5817 = vmatmul.mubr.msk.f32.vlgmr.msra.gmra.mxu1 %vm495_vm1, %v6484_v60 }
 0x126   :  { %5819 = vmatprep.subr.mxu0 %v6312_v11  ;;  %5824 = vmatprep.subr.mxu1 %v6312_v11 }
 0x127   :  { %5821 = vmatprep.mubr.msk.f32.mxu0 %vm6313_vm2, %v6312_v11  ;;  %5826 = vmatprep.mubr.msk.f32.mxu1 %vm6313_vm2, %v6312_v11 }
 0x1d2   :  { %v5763_v18 = vpop.f32.mrf.mxu0  ;;  %v5774_v25 = vpop.f32.mrf.mxu1 }
 0x1d3   :  { %v574_v21 = vadd.f32 %v5763_v18, %v5449_v17  ;;  %v667_v44 = vmul.f32 %v5774_v25, %v6525_v32 }
 0x1d4   :  { %v568_v22 = vpop.f32.mrf.mxu0  ;;  %v649_v42 = vpop.f32.mrf.mxu1 }
 0x1d5   :  { %v569_v23 = vadd.f32 %v5449_v17, %v568_v22  ;;  %v1136_v24 = vrot.slane %v574_v21, %v6519_v19  ;;  %v666_v54 = vmul.f32 %v6521_v20, %v649_v42  ;;  %v669_v0 = vadd.f32 %v667_v44, %v578_v45 }
 0x1d7   :  { %v1081_v26 = vcombine.high %v569_v23, %v569_v23  ;;  %v1088_v31 = vrot.slane %v569_v23, %v6519_v19  ;;  %v1137_v37 = vcombine.high %v1136_v24, %v1136_v24  ;;  %v1144_v52 = vrot.slane %v1136_v24, %v6519_v19 }
 0x1d8   :  { %v668_v6 = vadd.f32 %v666_v54, %v577_v62 }
 0x1d9   :  { %v1095_v34 = vrot.slane %v1081_v26, %v6519_v19  ;;  %v1096_v35 = vcombine.high %v1088_v31, %v1088_v31  ;;  %v1104_v39 = vrot.slane %v1088_v31, %v6519_v19  ;;  %v1151_v56 = vrot.slane %v1137_v37, %v6519_v19 }
 0x1db   :  { %v1097_v38 = vcombine.high %v1095_v34, %v1095_v34  ;;  %v1111_v40 = vrot.slane %v1095_v34, %v6519_v19  ;;  %v1118_v41 = vrot.slane %v1096_v35, %v6519_v19  ;;  %v5785_v43 = vpop.f32.mrf.mxu0  ;;  %v5796_v63 = vpop.f32.mrf.mxu1  ;;  %v1366_v8 = vrot.slane %v1151_v56, %v6519_v19 }
 0x1dc   :  { %v751_v55 = vmul.f32 %v5785_v43, %v6462_v29  ;;  %v835_v15 = vmul.f32 %v5796_v63, %v6464_v30 }
 0x1dd   :  { %v1125_v46 = vrot.slane %v1097_v38, %v6519_v19  ;;  %v1127_v47 = vcombine.high %v1111_v40, %v1111_v40  ;;  %v1191_v48 = vcombine.low %v1104_v39, %v1118_v41  ;;  %v741_v50 = vpop.f32.mrf.mxu0  ;;  %v5463_v53 = vcombine.high %v1104_v39, %v1118_v41  ;;  %v825_v12 = vpop.f32.mrf.mxu1 }
 0x1de   :  { %v1213_v2 = vrot.slane %v1111_v40, %v6519_v19  ;;  %v750_v3 = vmul.f32 %v741_v50, %v6458_v27  ;;  %v753_v7 = vadd.f32 %v751_v55, %v669_v0  ;;  %v834_v24 = vmul.f32 %v825_v12, %v6460_v28 }
 0x1df   :  { %v1129_v57 = vcombine.high %v1125_v46, %v1125_v46  ;;  %v1199_v58 = vrot.slane %v1191_v48, %v6519_v19  ;;  %v1344_v61 = vcombine.low %v1125_v46, %v1127_v47  ;;  %v1206_v1 = vrot.slane %v5463_v53, %v6519_v19 }
 0x1e0   :  { %v1228_v14 = vrot.slane %v1213_v2, %v6519_v19  ;;  %v752_v16 = vadd.f32 %v750_v3, %v668_v6  ;;  %v837_v23 = vadd.f32 %v835_v15, %v753_v7  ;;  %v1381_v26 = vrot.slane %v1366_v8, %v6519_v19 }
 0x1e1   :  { %v1345_v4 = vcombine.low %v1129_v57, %v1144_v52  ;;  %v1214_v5 = vcombine.low %v1199_v58, %v1206_v1  ;;  %v1352_v9 = vrot.slane %v1344_v61, %v6519_v19 }
 0x1e2   :  { %v836_v37 = vadd.f32 %v834_v24, %v752_v16 }
 0x1e3   :  { %v1359_v10 = vrot.slane %v1345_v4, %v6519_v19  ;;  %v1221_v13 = vrot.slane %v1214_v5, %v6519_v19 }
 0x1e5   :  { %v1367_v17 = vcombine.low %v1352_v9, %v1359_v10  ;;  %v5807_v18 = vpop.f32.mrf.mxu0  ;;  %v5818_v21 = vpop.f32.mrf.mxu1  ;;  %v6553_v22 = vcombine.low %v1221_v13, %v1228_v14 }
 0x1e6   :  { %v919_v25 = vmul.f32 %v5807_v18, %v6469_v36  ;;  %v1003_v39 = vmul.f32 %v5818_v21, %v6475_v49 }
 0x1e7   :  { %v1374_v31 = vrot.slane %v1367_v17, %v6519_v19  ;;  %v909_v34 = vpop.f32.mrf.mxu0  ;;  %v993_v35 = vpop.f32.mrf.mxu1  ;;  %5820 = vmatpush3.xpose.msk.msra.mxu0 %vm1230_vm3, %v6553_v22 }
 0x1e8   :  { %v921_v38 = vadd.f32 %v919_v25, %v837_v23  ;;  %v918_v40 = vmul.f32 %v909_v34, %v6467_v33  ;;  %5829 = vmatprep.subr.mxu0 %v6312_v11  ;;  %v1002_v44 = vmul.f32 %v993_v35, %v6477_v51 }
 0x1e9   :  { %v6563_v41 = vcombine.low %v1374_v31, %v1381_v26 }
 0x1ea   :  { %v1005_v42 = vadd.f32 %v1003_v39, %v921_v38  ;;  %v920_v43 = vadd.f32 %v918_v40, %v836_v37 }
 0x1eb   :  { %5825 = vmatpush3.xpose.msk.msra.mxu1 %vm1230_vm3, %v6563_v41 }
 0x1ec   :  { %v1004_v45 = vadd.f32 %v1002_v44, %v920_v43  ;;  %5834 = vmatprep.subr.mxu1 %v6312_v11  ;;  %v1063_v46 = vrot.slane %v1005_v42, %v6519_v19 }
 0x1ee   :  { %v1008_v47 = vcombine.high %v1004_v45, %v1004_v45  ;;  %v1015_v48 = vrot.slane %v1004_v45, %v6519_v19  ;;  %v1064_v53 = vcombine.high %v1063_v46, %v1063_v46  ;;  %v1071_v63 = vrot.slane %v1063_v46, %v6519_v19 }
 0x1f0   :  { %v1022_v50 = vrot.slane %v1008_v47, %v6519_v19  ;;  %v1023_v52 = vcombine.high %v1015_v48, %v1015_v48  ;;  %v1031_v55 = vrot.slane %v1015_v48, %v6519_v19  ;;  %v1078_v1 = vrot.slane %v1064_v53, %v6519_v19 }
 0x1f2   :  { %v1024_v54 = vcombine.high %v1022_v50, %v1022_v50  ;;  %v1038_v56 = vrot.slane %v1022_v50, %v6519_v19  ;;  %v1045_v57 = vrot.slane %v1023_v52, %v6519_v19  ;;  %v1327_v9 = vrot.slane %v1078_v1, %v6519_v19 }
 0x1f4   :  { %v1052_v58 = vrot.slane %v1024_v54, %v6519_v19  ;;  %v1054_v61 = vcombine.high %v1038_v56, %v1038_v56  ;;  %v1152_v62 = vcombine.low %v1031_v55, %v1045_v57  ;;  %v5462_v0 = vcombine.high %v1031_v55, %v1045_v57 }
 0x1f5   :  { %v1174_v6 = vrot.slane %v1038_v56, %v6519_v19  ;;  %v1342_v17 = vrot.slane %v1327_v9, %v6519_v19 }
 0x1f6   :  { %v1056_v2 = vcombine.high %v1052_v58, %v1052_v58  ;;  %v1160_v3 = vrot.slane %v1152_v62, %v6519_v19  ;;  %v1305_v4 = vcombine.low %v1052_v58, %v1054_v61  ;;  %v1167_v5 = vrot.slane %v5462_v0, %v6519_v19 }
 0x1f7   :  { %v1189_v13 = vrot.slane %v1174_v6, %v6519_v19 }
 0x1f8   :  { %v1306_v7 = vcombine.low %v1056_v2, %v1071_v63  ;;  %v1175_v8 = vcombine.low %v1160_v3, %v1167_v5  ;;  %v1313_v10 = vrot.slane %v1305_v4, %v6519_v19 }
 0x1fa   :  { %v1320_v12 = vrot.slane %v1306_v7, %v6519_v19  ;;  %v1182_v14 = vrot.slane %v1175_v8, %v6519_v19 }
 0x1fc   :  { %v1328_v15 = vcombine.low %v1313_v10, %v1320_v12  ;;  %v6587_v16 = vcombine.low %v1182_v14, %v1189_v13 }
 0x1fe   :  { %v1335_v18 = vrot.slane %v1328_v15, %v6519_v19  ;;  %5822 = vmatmul.mubr.msk.f32.vlgmr.msra.gmra.mxu0 %vm1230_vm3, %v6587_v16 }
 0x1ff   :  { %5831 = vmatprep.mubr.msk.f32.mxu0 %vm6313_vm2, %v6312_v11 }
 0x200   :  { %v6593_v21 = vcombine.low %v1335_v18, %v1342_v17 }
 0x202   :  { %5827 = vmatmul.mubr.msk.f32.vlgmr.msra.gmra.mxu1 %vm1230_vm3, %v6593_v21 }
 0x203   :  { %5836 = vmatprep.mubr.msk.f32.mxu1 %vm6313_vm2, %v6312_v11 }
 0x2be   :  { %v1301_v23 = vpop.f32.mrf.mxu0 }
 0x2bf   :  { %v1457_v24 = vmul.f32 0.35355338, %v1301_v23 }
 0x2c0   :  { %v5823_v25 = vpop.f32.mrf.mxu0 }
 0x2c1   :  { %v1460_v26 = vsel %vm1459_vm4, %v1457_v24, -inf }
 0x2c2   :  { %v1453_v31 = vpop.f32.mrf.mxu1  ;;  %1461 = vmax.xlane.f32.xlu0 %v1460_v26 }
 0x2c3   :  { %v1458_v34 = vmul.f32 0.35355338, %v1453_v31 }
 0x2c4   :  { %v5828_v35 = vpop.f32.mrf.mxu1 }
 0x2c5   :  { %v1463_v37 = vsel %vm1459_vm4, %v1458_v34, -inf }
 0x2c6   :  { %1464 = vmax.xlane.f32.xlu1 %v1463_v37 }
 0x2d7   :  { %1482 = vrot.lane.b32.xlu1 %v6553_v22, %s6315_s13 }
 0x2db   :  { %1640 = vrot.lane.b32.xlu1 %v6553_v22, %s6316_s8 }
 0x2df   :  { %1718 = vrot.lane.b32.xlu1 %v6563_v41, %s6316_s8 }
 0x2e3   :  { %1716 = vrot.lane.b32.xlu1 %v6593_v21, %s6316_s8 }
 0x34b   :  { %v1462_v38 = vpop.xlane.xlu0 %1461 }
 0x34c   :  { %v1466_v39 = vsub.f32 %v1457_v24, %v1462_v38 }
 0x34e   :  { %v1468_v40 = vmul.f32 1.442695, %v1466_v39 }
 0x34f   :  { %v1465_v42 = vpop.xlane.xlu1 %1464 }
 0x350   :  { %v1467_v43 = vsub.f32 %v1458_v34, %v1465_v42  ;;  %6100 = vpow2.f32 %v1468_v40 }
 0x352   :  { %v1470_v44 = vmul.f32 1.442695, %v1467_v43 }
 0x353   :  { %v1483_v45 = vpop.permute.xlu1 %1482 }
 0x354   :  { %6102 = vpow2.f32 %v1470_v44  ;;  %5830 = vmatpush3.msk.msra.mxu0 %vm1488_vm5, %v1483_v45 }
 0x355   :  { %5839 = vmatprep.subr.mxu0 %v6312_v11 }
 0x357   :  { %v1641_v55 = vpop.permute.xlu1 %1640 }
 0x35b   :  { %v1719_v61 = vpop.permute.xlu1 %1718 }
 0x35d   :  { %v6101_v46 = vpop.eup %6100 }
 0x35e   :  { %v1472_v47 = vsel %vm1459_vm4, %v6101_v46, 0.0 }
 0x35f   :  { %1473 = vadd.xlane.f32.xlu0 %v1472_v47  ;;  %v1717_v0 = vpop.permute.xlu1 %1716 }
 0x361   :  { %v6103_v48 = vpop.eup %6102 }
 0x362   :  { %v1475_v50 = vsel %vm1459_vm4, %v6103_v48, 0.0 }
 0x363   :  { %1476 = vadd.xlane.f32.xlu0 %v1475_v50 }
 0x379   :  { %1561 = vrot.lane.b32.xlu0 %v6563_v41, %s6315_s13 }
 0x37d   :  { %1638 = vrot.lane.b32.xlu0 %v6587_v16, %s6316_s8 }
 0x3e8   :  { %v1474_v52 = vpop.xlane.xlu0 %1473 }
 0x3e9   :  { %6104 = vrcp.f32 %v1474_v52 }
 0x3ec   :  { %v1477_v53 = vpop.xlane.xlu0 %1476 }
 0x3ed   :  { %6106 = vrcp.f32 %v1477_v53 }
 0x3f0   :  { %v1562_v54 = vpop.permute.xlu0 %1561 }
 0x3f1   :  { %5835 = vmatpush3.msk.msra.mxu1 %vm1488_vm5, %v1562_v54 }
 0x3f2   :  { %5844 = vmatprep.subr.mxu1 %v6312_v11 }
 0x3f4   :  { %v1639_v63 = vpop.permute.xlu0 %1638 }
 0x3f6   :  { %v6105_v56 = vpop.eup %6104 }
 0x3f7   :  { %v1480_v57 = vmul.f32 %v6105_v56, %v6101_v46 }
 0x3f9   :  { %5832 = vmatmul.mubr.msk.f32.vlgmr.msra.gmra.mxu0 %vm1484_vm6, %v1480_v57 }
 0x3fa   :  { %v6107_v58 = vpop.eup %6106  ;;  %5840 = vmatpush3.xpose.msk.msra.mxu0 %vm1230_vm3, %v1641_v55  ;;  %5841 = vmatprep.mubr.msk.f32.mxu0 %vm6313_vm2, %v6312_v11 }
 0x3fb   :  { %v1481_v62 = vmul.f32 %v6107_v58, %v6103_v48  ;;  %5849 = vmatprep.subr.mxu0 %v6312_v11 }
 0x3fd   :  { %5837 = vmatmul.mubr.msk.f32.vlgmr.msra.gmra.mxu1 %vm1484_vm6, %v1481_v62  ;;  %5842 = vmatmul.mubr.msk.f32.vlgmr.msra.gmra.mxu0 %vm1230_vm3, %v1639_v63 }
 0x3fe   :  { %5845 = vmatpush3.xpose.msk.msra.mxu1 %vm1230_vm3, %v1719_v61  ;;  %5846 = vmatprep.mubr.msk.f32.mxu1 %vm6313_vm2, %v6312_v11 }
 0x3ff   :  { %5854 = vmatprep.subr.mxu1 %v6312_v11  ;;  %5851 = vmatprep.mubr.msk.f32.mxu0 %vm6313_vm2, %v6312_v11 }
 0x401   :  { %5847 = vmatmul.mubr.msk.f32.vlgmr.msra.gmra.mxu1 %vm1230_vm3, %v1717_v0 }
 0x402   :  { %5856 = vmatprep.mubr.msk.f32.mxu1 %vm6313_vm2, %v6312_v11 }
 0x4b9   :  { %v6637_v1 = vpop.f32.mrf.mxu0 }
 0x4bb   :  { %v5833_v2 = vpop.f32.mrf.mxu0 }
 0x4bd   :  { %v6639_v3 = vpop.f32.mrf.mxu1  ;;  %v1712_v4 = vpop.f32.mrf.mxu0 }
 0x4be   :  { %v1794_v5 = vmul.f32 0.35355338, %v1712_v4 }
 0x4bf   :  { %v5838_v6 = vpop.f32.mrf.mxu1  ;;  %v5843_v7 = vpop.f32.mrf.mxu0 }
 0x4c0   :  { %v1796_v8 = vsel %vm1459_vm4, %v1794_v5, -inf }
 0x4c1   :  { %1797 = vmax.xlane.f32.xlu0 %v1796_v8  ;;  %v1790_v9 = vpop.f32.mrf.mxu1 }
 0x4c2   :  { %v1795_v10 = vmul.f32 0.35355338, %v1790_v9 }
 0x4c3   :  { %v5848_v12 = vpop.f32.mrf.mxu1 }
 0x4c4   :  { %v1799_v13 = vsel %vm1459_vm4, %v1795_v10, -inf }
 0x4c5   :  { %1800 = vmax.xlane.f32.xlu1 %v1799_v13 }
 0x4d6   :  { %1818 = vrot.lane.b32.xlu1 %v6553_v22, %s6317_s14 }
 0x4da   :  { %1974 = vrot.lane.b32.xlu1 %v6553_v22, %s6318_s15 }
 0x4de   :  { %2052 = vrot.lane.b32.xlu1 %v6563_v41, %s6318_s15 }
 0x4e2   :  { %2050 = vrot.lane.b32.xlu1 %v6593_v21, %s6318_s15 }
 0x54a   :  { %v1798_v14 = vpop.xlane.xlu0 %1797 }
 0x54b   :  { %v1802_v15 = vsub.f32 %v1794_v5, %v1798_v14 }
 0x54d   :  { %v1804_v17 = vmul.f32 1.442695, %v1802_v15 }
 0x54e   :  { %v1801_v18 = vpop.xlane.xlu1 %1800 }
 0x54f   :  { %6108 = vpow2.f32 %v1804_v17  ;;  %v1803_v23 = vsub.f32 %v1795_v10, %v1801_v18 }
 0x551   :  { %v1806_v24 = vmul.f32 1.442695, %v1803_v23 }
 0x552   :  { %v1819_v25 = vpop.permute.xlu1 %1818 }
 0x553   :  { %6110 = vpow2.f32 %v1806_v24  ;;  %5850 = vmatpush3.msk.msra.mxu0 %vm1488_vm5, %v1819_v25 }
 0x554   :  { %5859 = vmatprep.subr.mxu0 %v6312_v11 }
 0x556   :  { %v1975_v40 = vpop.permute.xlu1 %1974 }
 0x55a   :  { %v2053_v45 = vpop.permute.xlu1 %2052 }
 0x55c   :  { %v6109_v26 = vpop.eup %6108 }
 0x55d   :  { %v1808_v31 = vsel %vm1459_vm4, %v6109_v26, 0.0 }
 0x55e   :  { %1809 = vadd.xlane.f32.xlu0 %v1808_v31  ;;  %v2051_v48 = vpop.permute.xlu1 %2050 }
 0x560   :  { %v6111_v34 = vpop.eup %6110 }
 0x561   :  { %v1811_v35 = vsel %vm1459_vm4, %v6111_v34, 0.0 }
 0x562   :  { %1812 = vadd.xlane.f32.xlu0 %v1811_v35 }
 0x578   :  { %1895 = vrot.lane.b32.xlu0 %v6563_v41, %s6317_s14 }
 0x57c   :  { %1972 = vrot.lane.b32.xlu0 %v6587_v16, %s6318_s15 }
 0x5e7   :  { %v1810_v37 = vpop.xlane.xlu0 %1809 }
 0x5e8   :  { %6112 = vrcp.f32 %v1810_v37 }
 0x5eb   :  { %v1813_v38 = vpop.xlane.xlu0 %1812 }
 0x5ec   :  { %6114 = vrcp.f32 %v1813_v38 }
 0x5ef   :  { %v1896_v39 = vpop.permute.xlu0 %1895 }
 0x5f0   :  { %5855 = vmatpush3.msk.msra.mxu1 %vm1488_vm5, %v1896_v39 }
 0x5f1   :  { %5864 = vmatprep.subr.mxu1 %v6312_v11 }
 0x5f3   :  { %v1973_v47 = vpop.permute.xlu0 %1972 }
 0x5f5   :  { %v6113_v42 = vpop.eup %6112 }
 0x5f6   :  { %v1816_v43 = vmul.f32 %v6113_v42, %v6109_v26 }
 0x5f8   :  { %5852 = vmatmul.mubr.msk.f32.vlgmr.msra.gmra.mxu0 %vm1484_vm6, %v1816_v43 }
 0x5f9   :  { %v6115_v44 = vpop.eup %6114  ;;  %5860 = vmatpush3.xpose.msk.msra.mxu0 %vm1230_vm3, %v1975_v40  ;;  %5861 = vmatprep.mubr.msk.f32.mxu0 %vm6313_vm2, %v6312_v11 }
 0x5fa   :  { %v1817_v46 = vmul.f32 %v6115_v44, %v6111_v34  ;;  %5869 = vmatprep.subr.mxu0 %v6312_v11 }
 0x5fc   :  { %5857 = vmatmul.mubr.msk.f32.vlgmr.msra.gmra.mxu1 %vm1484_vm6, %v1817_v46  ;;  %5862 = vmatmul.mubr.msk.f32.vlgmr.msra.gmra.mxu0 %vm1230_vm3, %v1973_v47 }
 0x5fd   :  { %5865 = vmatpush3.xpose.msk.msra.mxu1 %vm1230_vm3, %v2053_v45  ;;  %5866 = vmatprep.mubr.msk.f32.mxu1 %vm6313_vm2, %v6312_v11 }
 0x5fe   :  { %5874 = vmatprep.subr.mxu1 %v6312_v11  ;;  %5871 = vmatprep.mubr.msk.f32.mxu0 %vm6313_vm2, %v6312_v11 }
 0x600   :  { %5867 = vmatmul.mubr.msk.f32.vlgmr.msra.gmra.mxu1 %vm1230_vm3, %v2051_v48 }
 0x601   :  { %5876 = vmatprep.mubr.msk.f32.mxu1 %vm6313_vm2, %v6312_v11 }
 0x6b8   :  { %v6677_v50 = vpop.f32.mrf.mxu0 }
 0x6ba   :  { %v5853_v52 = vpop.f32.mrf.mxu0 }
 0x6bc   :  { %v6679_v53 = vpop.f32.mrf.mxu1  ;;  %v2046_v54 = vpop.f32.mrf.mxu0 }
 0x6bd   :  { %v2128_v55 = vmul.f32 0.35355338, %v2046_v54 }
 0x6be   :  { %v5858_v56 = vpop.f32.mrf.mxu1  ;;  %v5863_v57 = vpop.f32.mrf.mxu0 }
 0x6bf   :  { %v2130_v58 = vsel %vm1459_vm4, %v2128_v55, -inf }
 0x6c0   :  { %2131 = vmax.xlane.f32.xlu0 %v2130_v58  ;;  %v2124_v61 = vpop.f32.mrf.mxu1 }
 0x6c1   :  { %v2129_v62 = vmul.f32 0.35355338, %v2124_v61 }
 0x6c2   :  { %v5868_v63 = vpop.f32.mrf.mxu1 }
 0x6c3   :  { %v2133_v0 = vsel %vm1459_vm4, %v2129_v62, -inf }
 0x6c4   :  { %2134 = vmax.xlane.f32.xlu1 %v2133_v0 }
 0x6d5   :  { %2152 = vrot.lane.b32.xlu1 %v6553_v22, %s6319_s16 }
 0x6d9   :  { %2308 = vrot.lane.b32.xlu1 %v6553_v22, %s6320_s17 }
 0x6dd   :  { %2386 = vrot.lane.b32.xlu1 %v6563_v41, %s6320_s17 }
 0x6e1   :  { %2384 = vrot.lane.b32.xlu1 %v6593_v21, %s6320_s17 }
 0x749   :  { %v2132_v2 = vpop.xlane.xlu0 %2131 }
 0x74a   :  { %v2136_v4 = vsub.f32 %v2128_v55, %v2132_v2 }
 0x74c   :  { %v2138_v5 = vmul.f32 1.442695, %v2136_v4 }
 0x74d   :  { %v2135_v6 = vpop.xlane.xlu1 %2134 }
 0x74e   :  { %6116 = vpow2.f32 %v2138_v5  ;;  %v2137_v7 = vsub.f32 %v2129_v62, %v2135_v6 }
 0x750   :  { %v2140_v8 = vmul.f32 1.442695, %v2137_v7 }
 0x751   :  { %v2153_v9 = vpop.permute.xlu1 %2152 }
 0x752   :  { %6118 = vpow2.f32 %v2140_v8  ;;  %5870 = vmatpush3.msk.msra.mxu0 %vm1488_vm5, %v2153_v9  ;;  %v2754_v9 = vld [vmem:[#allocation10 + $0x18] sm:$0xff] }
 0x753   :  { %5879 = vmatprep.subr.mxu0 %v6312_v11 }
 0x755   :  { %v2309_v18 = vpop.permute.xlu1 %2308 }
 0x759   :  { %v2387_v26 = vpop.permute.xlu1 %2386 }
 0x75b   :  { %v6117_v10 = vpop.eup %6116 }
 0x75c   :  { %v2142_v12 = vsel %vm1459_vm4, %v6117_v10, 0.0 }
 0x75d   :  { %2143 = vadd.xlane.f32.xlu0 %v2142_v12  ;;  %v2385_v34 = vpop.permute.xlu1 %2384  ;;  %v2753_v12 = vld [vmem:[#allocation10 + $0x10] sm:$0xff] }
 0x75f   :  { %v6119_v13 = vpop.eup %6118 }
 0x760   :  { %v2145_v21 = vsel %vm1459_vm4, %v6119_v13, 0.0 }
 0x761   :  { %2146 = vadd.xlane.f32.xlu0 %v2145_v21 }
 0x777   :  { %2229 = vrot.lane.b32.xlu0 %v6563_v41, %s6319_s16 }
 0x77b   :  { %2306 = vrot.lane.b32.xlu0 %v6587_v16, %s6320_s17 }
 0x7e6   :  { %v2144_v14 = vpop.xlane.xlu0 %2143 }
 0x7e7   :  { %6120 = vrcp.f32 %v2144_v14  ;;  %v2751_v14 = vld [vmem:[#allocation10] sm:$0xff] }
 0x7ea   :  { %v2147_v15 = vpop.xlane.xlu0 %2146 }
 0x7eb   :  { %6122 = vrcp.f32 %v2147_v15 }
 0x7ee   :  { %v2230_v17 = vpop.permute.xlu0 %2229 }
 0x7ef   :  { %5875 = vmatpush3.msk.msra.mxu1 %vm1488_vm5, %v2230_v17 }
 0x7f0   :  { %5884 = vmatprep.subr.mxu1 %v6312_v11 }
 0x7f2   :  { %v2307_v31 = vpop.permute.xlu0 %2306 }
 0x7f4   :  { %v6121_v23 = vpop.eup %6120 }
 0x7f5   :  { %v2150_v24 = vmul.f32 %v6121_v23, %v6117_v10 }
 0x7f7   :  { %5872 = vmatmul.mubr.msk.f32.vlgmr.msra.gmra.mxu0 %vm1484_vm6, %v2150_v24 }
 0x7f8   :  { %v6123_v25 = vpop.eup %6122  ;;  %5880 = vmatpush3.xpose.msk.msra.mxu0 %vm1230_vm3, %v2309_v18  ;;  %5881 = vmatprep.mubr.msk.f32.mxu0 %vm6313_vm2, %v6312_v11 }
 0x7f9   :  { %v2151_v16 = vmul.f32 %v6123_v25, %v6119_v13  ;;  %5889 = vmatprep.subr.mxu0 %v6312_v11  ;;  %v2752_v13 = vld [vmem:[#allocation10 + $0x8] sm:$0xff] }
 0x7fb   :  { %5877 = vmatmul.mubr.msk.f32.vlgmr.msra.gmra.mxu1 %vm1484_vm6, %v2151_v16  ;;  %5882 = vmatmul.mubr.msk.f32.vlgmr.msra.gmra.mxu0 %vm1230_vm3, %v2307_v31 }
 0x7fc   :  { %5885 = vmatpush3.xpose.msk.msra.mxu1 %vm1230_vm3, %v2387_v26  ;;  %5886 = vmatprep.mubr.msk.f32.mxu1 %vm6313_vm2, %v6312_v11 }
 0x7fd   :  { %5894 = vmatprep.subr.mxu1 %v6312_v11  ;;  %5891 = vmatprep.mubr.msk.f32.mxu0 %vm6313_vm2, %v6312_v11 }
 0x7ff   :  { %5887 = vmatmul.mubr.msk.f32.vlgmr.msra.gmra.mxu1 %vm1230_vm3, %v2385_v34 }
 0x800   :  { %5896 = vmatprep.mubr.msk.f32.mxu1 %vm6313_vm2, %v6312_v11 }
 0x8b7   :  { %v2225_v35 = vpop.f32.mrf.mxu0 }
 0x8b9   :  { %v5873_v37 = vpop.f32.mrf.mxu0 }
 0x8bb   :  { %v2302_v38 = vpop.f32.mrf.mxu1  ;;  %v2380_v39 = vpop.f32.mrf.mxu0 }
 0x8bc   :  { %v2462_v40 = vmul.f32 0.35355338, %v2380_v39 }
 0x8bd   :  { %v5878_v42 = vpop.f32.mrf.mxu1  ;;  %v5883_v43 = vpop.f32.mrf.mxu0 }
 0x8be   :  { %v2464_v44 = vsel %vm1459_vm4, %v2462_v40, -inf }
 0x8bf   :  { %2465 = vmax.xlane.f32.xlu0 %v2464_v44  ;;  %v2458_v45 = vpop.f32.mrf.mxu1 }
 0x8c0   :  { %v2463_v46 = vmul.f32 0.35355338, %v2458_v45 }
 0x8c1   :  { %v5888_v47 = vpop.f32.mrf.mxu1 }
 0x8c2   :  { %v2467_v48 = vsel %vm1459_vm4, %v2463_v46, -inf }
 0x8c3   :  { %2468 = vmax.xlane.f32.xlu1 %v2467_v48 }
 0x8d4   :  { %2486 = vrot.lane.b32.xlu1 %v6553_v22, %s6321_s18 }
 0x8d8   :  { %2642 = vrot.lane.b32.xlu1 %v6677_v50, %s6303_s27 }
 0x8dc   :  { %2644 = vrot.lane.b32.xlu1 %v6679_v53, %s6303_s27 }
 0x8e0   :  { %2652 = vrot.lane.b32.xlu1 %v2302_v38, %s6322_s3 }
 0x948   :  { %v2466_v52 = vpop.xlane.xlu0 %2465 }
 0x949   :  { %v2470_v54 = vsub.f32 %v2462_v40, %v2466_v52 }
 0x94b   :  { %v2472_v55 = vmul.f32 1.442695, %v2470_v54 }
 0x94c   :  { %v2469_v56 = vpop.xlane.xlu1 %2468 }
 0x94d   :  { %6124 = vpow2.f32 %v2472_v55  ;;  %v2471_v57 = vsub.f32 %v2463_v46, %v2469_v56 }
 0x94f   :  { %v2474_v58 = vmul.f32 1.442695, %v2471_v57 }
 0x950   :  { %v2487_v61 = vpop.permute.xlu1 %2486 }
 0x951   :  { %6126 = vpow2.f32 %v2474_v58  ;;  %5890 = vmatpush3.msk.msra.mxu0 %vm1488_vm5, %v2487_v61 }
 0x952   :  { %5899 = vmatprep.subr.mxu0 %v2754_v9 }
 0x954   :  { %v2643_v15 = vpop.permute.xlu1 %2642 }
 0x955   :  { %v2664_v23 = vsel %vm1230_vm3, %v6637_v1, %v2643_v15 }
 0x958   :  { %v2645_v17 = vpop.permute.xlu1 %2644 }
 0x95a   :  { %v6125_v22 = vpop.eup %6124 }
 0x95b   :  { %v2476_v50 = vsel %vm1459_vm4, %v6125_v22, 0.0 }
 0x95c   :  { %2477 = vadd.xlane.f32.xlu0 %v2476_v50  ;;  %v2653_v24 = vpop.permute.xlu1 %2652 }
 0x95e   :  { %v6127_v62 = vpop.eup %6126 }
 0x95f   :  { %v2479_v53 = vsel %vm1459_vm4, %v6127_v62, 0.0 }
 0x960   :  { %2480 = vadd.xlane.f32.xlu0 %v2479_v53 }
 0x976   :  { %2563 = vrot.lane.b32.xlu0 %v6563_v41, %s6321_s18 }
 0x97a   :  { %2650 = vrot.lane.b32.xlu0 %v2225_v35, %s6322_s3  ;;  %v2665_v35 = vsel %vm1230_vm3, %v6639_v3, %v2645_v17 }
 0x97b   :  { %v2667_v37 = vsel %vm118_vm0, %v2665_v35, %v2653_v24 }
 0x9e5   :  { %v2478_v63 = vpop.xlane.xlu0 %2477 }
 0x9e6   :  { %6128 = vrcp.f32 %v2478_v63 }
 0x9e9   :  { %v2481_v0 = vpop.xlane.xlu0 %2480 }
 0x9ea   :  { %6130 = vrcp.f32 %v2481_v0 }
 0x9ed   :  { %v2564_v2 = vpop.permute.xlu0 %2563 }
 0x9ee   :  { %5895 = vmatpush3.msk.msra.mxu1 %vm1488_vm5, %v2564_v2 }
 0x9f1   :  { %v2651_v18 = vpop.permute.xlu0 %2650 }
 0x9f2   :  { %v2666_v25 = vsel %vm118_vm0, %v2664_v23, %v2651_v18 }
 0x9f3   :  { %v6129_v4 = vpop.eup %6128 }
 0x9f4   :  { %v2484_v5 = vmul.f32 %v6129_v4, %v6125_v22 }
 0x9f6   :  { %5892 = vmatmul.mubr.msk.f32.vlgmr.msra.gmra.mxu0 %vm1484_vm6, %v2484_v5 }
 0x9f7   :  { %v6131_v6 = vpop.eup %6130  ;;  %5900 = vmatpush3.msra.mxu0 %v2754_v9  ;;  %v5496_v9 = vld [vmem:[%s7089_s9] ss:$0 sm:$0xff] }
 0x9f8   :  { %v2485_v7 = vmul.f32 %v6131_v6, %v6127_v62  ;;  %5901 = vmatprep.subr.mxu0 %v2753_v12 }
 0x9f9   :  { %5902 = vmatpush3.msra.mxu0 %v2753_v12 }
 0x9fa   :  { %5897 = vmatmul.mubr.msk.f32.vlgmr.msra.gmra.mxu1 %vm1484_vm6, %v2485_v7  ;;  %5903 = vmatprep.subr.mxu0 %v2752_v13 }
 0x9fb   :  { %5904 = vmatpush3.msra.mxu0 %v2752_v13 }
 0x9fc   :  { %5905 = vmatprep.subr.mxu0 %v2751_v14 }
 0x9fd   :  { %5906 = vmatpush3.msra.mxu0 %v2751_v14 }
 0xab6   :  { %v2559_v8 = vpop.f32.mrf.mxu0 }
 0xab7   :  { %2658 = vrot.lane.b32.xlu0 %v2559_v8, %s6323_s19 }
 0xab8   :  { %v5893_v41 = vpop.f32.mrf.mxu0 }
 0xaba   :  { %v2636_v10 = vpop.f32.mrf.mxu1 }
 0xabb   :  { %2660 = vrot.lane.b32.xlu1 %v2636_v10, %s6323_s19 }
 0xabc   :  { %v5898_v21 = vpop.f32.mrf.mxu1 }
 0xb29   :  { %v2659_v26 = vpop.permute.xlu0 %2658 }
 0xb2a   :  { %v2669_v16 = vsel %vm2668_vm7, %v2666_v25, %v2659_v26 }
 0xb2b   :  { %v2673_v31 = vcombine.high %v2669_v16, %v2669_v16  ;;  %v2680_v34 = vrot.slane %v2669_v16, %v6519_v19 }
 0xb2d   :  { %v2688_v38 = vcombine.high %v2680_v34, %v2680_v34  ;;  %v2661_v39 = vpop.permute.xlu1 %2660  ;;  %v2687_v40 = vrot.slane %v2673_v31, %v6519_v19  ;;  %v2695_v42 = vrot.slane %v2680_v34, %v6519_v19 }
 0xb2e   :  { %v2670_v1 = vsel %vm2668_vm7, %v2667_v37, %v2661_v39  ;;  %v2956_v39 = vld [vmem:[#allocation8 + $0x30] sm:$0xff] }
 0xb2f   :  { %v2709_v43 = vrot.slane %v2688_v38, %v6519_v19  ;;  %v2712_v44 = vcombine.high %v2670_v1, %v2670_v1  ;;  %v2719_v45 = vrot.slane %v2670_v1, %v6519_v19  ;;  %v2702_v52 = vrot.slane %v2687_v40, %v6519_v19  ;;  %v2957_v38 = vld [vmem:[#allocation8 + $0x38] sm:$0xff]  ;;  %v3053_v40 = vld [vmem:[#allocation7 + $0xb0] sm:$0xff]  ;;  %v2955_v1 = vld [vmem:[#allocation8 + $0x28] sm:$0xff] }
 0xb30   :  { %5910 = vmatprep.subr.mxu1 %v2957_v38 }
 0xb31   :  { %v2762_v46 = vcombine.low %v2695_v42, %v2709_v43  ;;  %v5497_v47 = vcombine.high %v2695_v42, %v2709_v43  ;;  %v2726_v48 = vrot.slane %v2712_v44, %v6519_v19  ;;  %v2727_v3 = vcombine.high %v2719_v45, %v2719_v45  ;;  %5911 = vmatpush3.msra.mxu1 %v2957_v38  ;;  %v3052_v42 = vld [vmem:[#allocation7 + $0xa8] sm:$0xff]  ;;  %v2954_v43 = vld [vmem:[#allocation8 + $0x20] sm:$0xff] }
 0xb32   :  { %v2734_v54 = vrot.slane %v2719_v45, %v6519_v19  ;;  %5912 = vmatprep.subr.mxu1 %v2956_v39  ;;  %v3051_v44 = vld [vmem:[#allocation7 + $0xa0] sm:$0xff]  ;;  %v3138_v45 = vld [vmem:[#allocation7 + $0xd8] sm:$0xff] }
 0xb33   :  { %v2748_v55 = vrot.slane %v2727_v3, %v6519_v19  ;;  %v2772_v56 = vrot.slane %v2762_v46, %v6519_v19  ;;  %v2779_v57 = vrot.slane %v5497_v47, %v6519_v19  ;;  %v2741_v22 = vrot.slane %v2726_v48, %v6519_v19  ;;  %5913 = vmatpush3.msra.mxu1 %v2956_v39  ;;  %v3222_v46 = vld [vmem:[#allocation7 + $0xf8] sm:$0xff] }
 0xb34   :  { %v2749_v58 = vcombine.high %v2734_v54, %v2734_v54  ;;  %v2764_v61 = vcombine.low %v2702_v52, %v2734_v54  ;;  %5914 = vmatprep.subr.mxu1 %v2955_v1 }
 0xb35   :  { %v2750_v50 = vcombine.high %v2748_v55, %v2748_v55  ;;  %v2794_v63 = vcombine.low %v2772_v56, %v2779_v57  ;;  %5915 = vmatpush3.msra.mxu1 %v2955_v1  ;;  %v5500_v57 = vld [vmem:[%s7090_s10] ss:$0 sm:$0xff] }
 0xb36   :  { %v2765_v62 = vcombine.low %v2748_v55, %v2749_v58  ;;  %v2786_v0 = vrot.slane %v2764_v61, %v6519_v19  ;;  %5916 = vmatprep.subr.mxu1 %v2954_v43  ;;  %v5501_v61 = vld [vmem:[%s7091_s11] ss:$0 sm:$0xff] }
 0xb37   :  { %v2811_v53 = vcombine.low %v2750_v50, %v2741_v22  ;;  %v2802_v6 = vrot.slane %v2794_v63, %v6519_v19  ;;  %5917 = vmatpush3.msra.mxu1 %v2954_v43 }
 0xb38   :  { %v2793_v2 = vrot.slane %v2765_v62, %v6519_v19  ;;  %5932 = vmatprep.subr.mxu1 %v3138_v45 }
 0xb39   :  { %v2818_v5 = vrot.slane %v2811_v53, %v6519_v19 }
 0xb3a   :  { %v2795_v4 = vcombine.low %v2786_v0, %v2793_v2  ;;  %v3137_v2 = vld [vmem:[#allocation7 + $0xd0] sm:$0xff] }
 0xb3b   :  { %v2825_v41 = vrot.slane %v2818_v5, %v6519_v19  ;;  %v3136_v5 = vld [vmem:[#allocation7 + $0xc8] sm:$0xff] }
 0xb3c   :  { %v2809_v7 = vrot.slane %v2795_v4, %v6519_v19  ;;  %v3221_v4 = vld [vmem:[#allocation7 + $0xf0] sm:$0xff] }
 0xb3e   :  { %v2810_v8 = vcombine.low %v2802_v6, %v2809_v7  ;;  %v3220_v6 = vld [vmem:[#allocation7 + $0xe8] sm:$0xff]  ;;  %v3135_v7 = vld [vmem:[#allocation7 + $0xc0] sm:$0xff] }
 0xb40   :  { %5907 = vmatprep.mubr.msk.f32.mxu0 %vm495_vm1, %v2810_v8  ;;  %v3219_v8 = vld [vmem:[#allocation7 + $0xe0] sm:$0xff] }
 0xb41   :  { %5908 = vmatmul.mubr.msk.f32.vlgmr.msra.gmra.mxu0 %vm495_vm1, %v2825_v41  ;;  %v3306_v41 = vld [vmem:[#allocation7 + $0x118] sm:$0xff] }
 0xc01   :  { %v5909_v10 = vpop.f32.mrf.mxu0 }
 0xc02   :  { %v2902_v12 = vadd.f32 %v5909_v10, %v5496_v9  ;;  %v3305_v10 = vld [vmem:[#allocation7 + $0x110] sm:$0xff] }
 0xc03   :  { %v2896_v13 = vpop.f32.mrf.mxu0 }
 0xc04   :  { %v2897_v21 = vadd.f32 %v5496_v9, %v2896_v13  ;;  %v2906_v14 = vadd.f32 %v2902_v12, %v6484_v60  ;;  %v3390_v9 = vld [vmem:[#allocation7 + $0x138] sm:$0xff]  ;;  %v3389_v12 = vld [vmem:[#allocation7 + $0x130] sm:$0xff]  ;;  %v3304_v13 = vld [vmem:[#allocation7 + $0x108] sm:$0xff] }
 0xc06   :  { %v2911_v15 = vsel %vm2910_vm8, %v2906_v14, 0.0  ;;  %v2905_v17 = vadd.f32 %v2897_v21, %v6482_v59  ;;  %v3054_v59 = vld [vmem:[#allocation7 + $0xb8] sm:$0xff]  ;;  %v3388_v21 = vld [vmem:[#allocation7 + $0x128] sm:$0xff] }
 0xc07   :  { %2912 = vadd.xlane.f32.xlu1 %v2911_v15  ;;  %5921 = vmatprep.subr.mxu0 %v3054_v59  ;;  %v3387_v15 = vld [vmem:[#allocation7 + $0x120] sm:$0xff] }
 0xc08   :  { %v2907_v18 = vsel %vm495_vm1, %v2905_v17, 0.0  ;;  %5922 = vmatpush3.msra.mxu0 %v3054_v59 }
 0xc09   :  { %2908 = vadd.xlane.f32.xlu0 %v2907_v18  ;;  %5923 = vmatprep.subr.mxu0 %v3053_v40  ;;  %v5503_v18 = vld [vmem:[%s7087_s7 + $0x1] ss:$0 sm:$0xff] }
 0xc0a   :  { %5924 = vmatpush3.msra.mxu0 %v3053_v40  ;;  %v5507_v40 = vld [vmem:[%s7085_s5 + $0x18] sm:$0x3] }
 0xc0b   :  { %5925 = vmatprep.subr.mxu0 %v3052_v42 }
 0xc0c   :  { %5926 = vmatpush3.msra.mxu0 %v3052_v42 }
 0xc0d   :  { %5927 = vmatprep.subr.mxu0 %v3051_v44 }
 0xc0e   :  { %5928 = vmatpush3.msra.mxu0 %v3051_v44 }
 0xc0f   :  { %5943 = vmatprep.subr.mxu0 %v3222_v46 }
 0xc90   :  { %v2913_v23 = vpop.xlane.xlu1 %2912 }
 0xc91   :  { %v2916_v24 = vmul.f32 0.03125, %v2913_v23 }
 0xc92   :  { %v2909_v25 = vpop.xlane.xlu0 %2908 }
 0xc93   :  { %v2915_v26 = vmul.f32 0.03125, %v2909_v25  ;;  %v2918_v16 = vsub.f32 %v2906_v14, %v2916_v24  ;;  %v3303_v14 = vld [vmem:[#allocation7 + $0x100] sm:$0xff] }
 0xc95   :  { %v2917_v31 = vsub.f32 %v2905_v17, %v2915_v26  ;;  %v2920_v37 = vmul.f32 %v2918_v16, %v2918_v16 }
 0xc97   :  { %v2919_v34 = vmul.f32 %v2917_v31, %v2917_v31  ;;  %v2924_v60 = vsel %vm2910_vm8, %v2920_v37, 0.0 }
 0xc99   :  { %v2921_v35 = vsel %vm495_vm1, %v2919_v34, 0.0 }
 0xc9a   :  { %2922 = vadd.xlane.f32.xlu0 %v2921_v35 }
 0xc9e   :  { %2925 = vadd.xlane.f32.xlu0 %v2924_v60 }
 0xd23   :  { %v2923_v47 = vpop.xlane.xlu0 %2922 }
 0xd24   :  { %v2927_v48 = vmul.f32 0.03125, %v2923_v47  ;;  %v5506_v47 = vld [vmem:[%s7085_s5 + $0x10] sm:$0xff] }
 0xd26   :  { %v2929_v3 = vadd.f32 1e-05, %v2927_v48 }
 0xd27   :  { %v2926_v52 = vpop.xlane.xlu0 %2925 }
 0xd28   :  { %6132 = vrsqrt.f32 %v2929_v3  ;;  %v2928_v54 = vmul.f32 0.03125, %v2926_v52 }
 0xd2a   :  { %v2930_v55 = vadd.f32 1e-05, %v2928_v54 }
 0xd2c   :  { %6134 = vrsqrt.f32 %v2930_v55 }
 0xd35   :  { %v6133_v56 = vpop.eup %6132 }
 0xd36   :  { %v2933_v58 = vmul.f32 %v6133_v56, %v2917_v31 }
 0xd38   :  { %v2942_v22 = vmul.f32 %v5500_v57, %v2933_v58 }
 0xd39   :  { %v6135_v50 = vpop.eup %6134 }
 0xd3a   :  { %v6780_v62 = vadd.f32 %v5501_v61, %v2942_v22  ;;  %v2934_v53 = vmul.f32 %v6135_v50, %v2918_v16 }
 0xd3c   :  { %v2943_v63 = vmul.f32 %v5500_v57, %v2934_v53  ;;  %5918 = vmatprep.mubr.msk.f32.mxu1 %vm495_vm1, %v6780_v62  ;;  %5929 = vmatprep.mubr.msk.f32.mxu0 %vm495_vm1, %v6780_v62 }
 0xd3e   :  { %v6786_v0 = vadd.f32 %v5501_v61, %v2943_v63 }
 0xd40   :  { %5919 = vmatmul.mubr.msk.f32.vlgmr.msra.gmra.mxu1 %vm495_vm1, %v6786_v0  ;;  %5930 = vmatmul.mubr.msk.f32.vlgmr.msra.gmra.mxu0 %vm495_vm1, %v6786_v0 }
 0xd41   :  { %5933 = vmatpush3.msra.mxu1 %v3138_v45  ;;  %5944 = vmatpush3.msra.mxu0 %v3222_v46 }
 0xd42   :  { %5934 = vmatprep.subr.mxu1 %v3137_v2  ;;  %5940 = vmatprep.mubr.msk.f32.mxu1 %vm495_vm1, %v6780_v62 }
 0xd43   :  { %5945 = vmatprep.subr.mxu0 %v3221_v4  ;;  %5951 = vmatprep.mubr.msk.f32.mxu0 %vm495_vm1, %v6780_v62 }
 0xd44   :  { %5935 = vmatpush3.msra.mxu1 %v3137_v2  ;;  %5946 = vmatpush3.msra.mxu0 %v3221_v4 }
 0xd45   :  { %5936 = vmatprep.subr.mxu1 %v3136_v5  ;;  %5947 = vmatprep.subr.mxu0 %v3220_v6 }
 0xd46   :  { %5937 = vmatpush3.msra.mxu1 %v3136_v5  ;;  %5948 = vmatpush3.msra.mxu0 %v3220_v6 }
 0xd47   :  { %5938 = vmatprep.subr.mxu1 %v3135_v7  ;;  %5949 = vmatprep.subr.mxu0 %v3219_v8 }
 0xd48   :  { %5939 = vmatpush3.msra.mxu1 %v3135_v7  ;;  %5950 = vmatpush3.msra.mxu0 %v3219_v8 }
 0xd49   :  { %5941 = vmatmul.mubr.msk.f32.vlgmr.msra.gmra.mxu1 %vm495_vm1, %v6786_v0  ;;  %5952 = vmatmul.mubr.msk.f32.vlgmr.msra.gmra.mxu0 %vm495_vm1, %v6786_v0 }
 0xd4a   :  { %5954 = vmatprep.subr.mxu1 %v3306_v41  ;;  %5965 = vmatprep.subr.mxu0 %v3390_v9 }
 0xd4b   :  { %5955 = vmatpush3.msra.mxu1 %v3306_v41  ;;  %5962 = vmatprep.mubr.msk.f32.mxu1 %vm495_vm1, %v6780_v62 }
 0xd4c   :  { %5966 = vmatpush3.msra.mxu0 %v3390_v9  ;;  %5973 = vmatprep.mubr.msk.f32.mxu0 %vm495_vm1, %v6780_v62 }
 0xd4d   :  { %5956 = vmatprep.subr.mxu1 %v3305_v10  ;;  %5967 = vmatprep.subr.mxu0 %v3389_v12 }
 0xd4e   :  { %5957 = vmatpush3.msra.mxu1 %v3305_v10  ;;  %5968 = vmatpush3.msra.mxu0 %v3389_v12 }
 0xd4f   :  { %5958 = vmatprep.subr.mxu1 %v3304_v13  ;;  %5969 = vmatprep.subr.mxu0 %v3388_v21 }
 0xd50   :  { %5959 = vmatpush3.msra.mxu1 %v3304_v13  ;;  %5970 = vmatpush3.msra.mxu0 %v3388_v21 }
 0xd51   :  { %5960 = vmatprep.subr.mxu1 %v3303_v14  ;;  %5971 = vmatprep.subr.mxu0 %v3387_v15 }
 0xd52   :  { %5961 = vmatpush3.msra.mxu1 %v3303_v14  ;;  %5972 = vmatpush3.msra.mxu0 %v3387_v15 }
 0xd53   :  { %5963 = vmatmul.mubr.msk.f32.vlgmr.msra.gmra.mxu1 %vm495_vm1, %v6786_v0  ;;  %5974 = vmatmul.mubr.msk.f32.vlgmr.msra.gmra.mxu0 %vm495_vm1, %v6786_v0 }
 0xd54   :  { %5976 = vmatprep.subr.mxu1 %v6312_v11  ;;  %5978 = vmatprep.mubr.msk.f32.mxu1 %vm6313_vm2, %v6312_v11 }
 0xd55   :  { %5986 = vmatprep.subr.mxu0 %v6312_v11  ;;  %5988 = vmatprep.mubr.msk.f32.mxu0 %vm6313_vm2, %v6312_v11 }
 0xe00   :  { %v5920_v17 = vpop.f32.mrf.mxu1  ;;  %v5931_v25 = vpop.f32.mrf.mxu0 }
 0xe01   :  { %v3131_v59 = vmul.f32 %v5931_v25, %v6525_v32  ;;  %v3044_v58 = vadd.f32 %v5920_v17, %v5503_v18 }
 0xe02   :  { %v3038_v23 = vpop.f32.mrf.mxu1  ;;  %v3121_v60 = vpop.f32.mrf.mxu0 }
 0xe03   :  { %v3039_v24 = vadd.f32 %v5503_v18, %v3038_v23  ;;  %v3130_v44 = vmul.f32 %v3121_v60, %v6521_v20  ;;  %v3133_v48 = vadd.f32 %v5507_v40, %v3131_v59  ;;  %v3600_v8 = vrot.slane %v3044_v58, %v6519_v19 }
 0xe05   :  { %v3545_v26 = vcombine.high %v3039_v24, %v3039_v24  ;;  %v3552_v16 = vrot.slane %v3039_v24, %v6519_v19  ;;  %v3132_v57 = vadd.f32 %v5506_v47, %v3130_v44  ;;  %v3608_v15 = vrot.slane %v3600_v8, %v6519_v19 }
 0xe07   :  { %v3559_v31 = vrot.slane %v3545_v26, %v6519_v19  ;;  %v3560_v34 = vcombine.high %v3552_v16, %v3552_v16  ;;  %v3568_v35 = vrot.slane %v3552_v16, %v6519_v19  ;;  %v3601_v26 = vcombine.high %v3600_v8, %v3600_v8 }
 0xe09   :  { %v3582_v37 = vrot.slane %v3560_v34, %v6519_v19  ;;  %v5942_v38 = vpop.f32.mrf.mxu1  ;;  %v3575_v39 = vrot.slane %v3559_v31, %v6519_v19  ;;  %v5953_v32 = vpop.f32.mrf.mxu0  ;;  %v3561_v55 = vcombine.high %v3559_v31, %v3559_v31 }
 0xe0a   :  { %v3215_v45 = vmul.f32 %v5942_v38, %v6462_v29  ;;  %v3299_v50 = vmul.f32 %v5953_v32, %v6464_v30 }
 0xe0b   :  { %v3655_v1 = vcombine.low %v3568_v35, %v3582_v37  ;;  %v3205_v42 = vpop.f32.mrf.mxu1  ;;  %v5519_v43 = vcombine.high %v3568_v35, %v3582_v37  ;;  %v3677_v52 = vrot.slane %v3575_v39, %v6519_v19  ;;  %v3289_v29 = vpop.f32.mrf.mxu0  ;;  %v3589_v63 = vrot.slane %v3561_v55, %v6519_v19 }
 0xe0c   :  { %v3214_v54 = vmul.f32 %v3205_v42, %v6458_v27  ;;  %v3217_v20 = vadd.f32 %v3215_v45, %v3133_v48  ;;  %v3298_v6 = vmul.f32 %v3289_v29, %v6460_v28  ;;  %v3591_v17 = vcombine.high %v3575_v39, %v3575_v39 }
 0xe0d   :  { %v3663_v46 = vrot.slane %v3655_v1, %v6519_v19  ;;  %v3670_v3 = vrot.slane %v5519_v43, %v6519_v19  ;;  %v3692_v22 = vrot.slane %v3677_v52, %v6519_v19  ;;  %v3593_v21 = vcombine.high %v3589_v63, %v3589_v63 }
 0xe0e   :  { %v3216_v53 = vadd.f32 %v3214_v54, %v3132_v57  ;;  %v3301_v27 = vadd.f32 %v3299_v50, %v3217_v20  ;;  %v3807_v25 = vcombine.low %v3589_v63, %v3591_v17  ;;  %v3615_v39 = vrot.slane %v3601_v26, %v6519_v19 }
 0xe0f   :  { %v3678_v56 = vcombine.low %v3663_v46, %v3670_v3  ;;  %v3808_v23 = vcombine.low %v3593_v21, %v3608_v15 }
 0xe10   :  { %v3300_v10 = vadd.f32 %v3298_v6, %v3216_v53  ;;  %v3815_v59 = vrot.slane %v3807_v25, %v6519_v19  ;;  %v3829_v54 = vrot.slane %v3615_v39, %v6519_v19 }
 0xe11   :  { %v3685_v61 = vrot.slane %v3678_v56, %v6519_v19  ;;  %v3822_v34 = vrot.slane %v3808_v23, %v6519_v19 }
 0xe12   :  { %v3844_v50 = vrot.slane %v3829_v54, %v6519_v19 }
 0xe13   :  { %v5964_v2 = vpop.f32.mrf.mxu1  ;;  %v5975_v4 = vpop.f32.mrf.mxu0  ;;  %v6839_v5 = vcombine.low %v3685_v61, %v3692_v22  ;;  %v3830_v43 = vcombine.low %v3815_v59, %v3822_v34 }
 0xe14   :  { %v3383_v7 = vmul.f32 %v5964_v2, %v6469_v36  ;;  %v3467_v30 = vmul.f32 %v5975_v4, %v6475_v49 }
 0xe15   :  { %v3373_v41 = vpop.f32.mrf.mxu1  ;;  %v3457_v9 = vpop.f32.mrf.mxu0  ;;  %5977 = vmatpush3.xpose.msk.msra.mxu1 %vm1230_vm3, %v6839_v5  ;;  %v3837_v57 = vrot.slane %v3830_v43, %v6519_v19 }
 0xe16   :  { %v3385_v12 = vadd.f32 %v3383_v7, %v3301_v27  ;;  %v3382_v13 = vmul.f32 %v3373_v41, %v6467_v33  ;;  %5981 = vmatprep.subr.mxu1 %v6312_v11  ;;  %v3466_v36 = vmul.f32 %v3457_v9, %v6477_v51 }
 0xe17   :  { %v6876_v2 = vcombine.low %v3837_v57, %v3844_v50 }
 0xe18   :  { %v3469_v14 = vadd.f32 %v3467_v30, %v3385_v12  ;;  %v3384_v28 = vadd.f32 %v3382_v13, %v3300_v10 }
 0xe1a   :  { %v3468_v18 = vadd.f32 %v3466_v36, %v3384_v28  ;;  %v3527_v24 = vrot.slane %v3469_v14, %v6519_v19 }
 0xe1c   :  { %v3472_v49 = vcombine.high %v3468_v18, %v3468_v18  ;;  %v3479_v33 = vrot.slane %v3468_v18, %v6519_v19  ;;  %v3528_v35 = vcombine.high %v3527_v24, %v3527_v24  ;;  %v3535_v44 = vrot.slane %v3527_v24, %v6519_v19 }
 0xe1e   :  { %v3486_v16 = vrot.slane %v3472_v49, %v6519_v19  ;;  %v3487_v31 = vcombine.high %v3479_v33, %v3479_v33  ;;  %v3495_v51 = vrot.slane %v3479_v33, %v6519_v19  ;;  %v3542_v46 = vrot.slane %v3528_v35, %v6519_v19 }
 0xe20   :  { %v3488_v37 = vcombine.high %v3486_v16, %v3486_v16  ;;  %v3502_v60 = vrot.slane %v3486_v16, %v6519_v19  ;;  %v3509_v38 = vrot.slane %v3487_v31, %v6519_v19  ;;  %v3790_v20 = vrot.slane %v3542_v46, %v6519_v19 }
 0xe22   :  { %v3516_v40 = vrot.slane %v3488_v37, %v6519_v19  ;;  %v3518_v1 = vcombine.high %v3502_v60, %v3502_v60  ;;  %v3616_v42 = vcombine.low %v3495_v51, %v3509_v38  ;;  %v5518_v45 = vcombine.high %v3495_v51, %v3509_v38 }
 0xe23   :  { %v3638_v52 = vrot.slane %v3502_v60, %v6519_v19  ;;  %v3805_v4 = vrot.slane %v3790_v20, %v6519_v19 }
 0xe24   :  { %v3520_v47 = vcombine.high %v3516_v40, %v3516_v40  ;;  %v3624_v32 = vrot.slane %v3616_v42, %v6519_v19  ;;  %v3768_v48 = vcombine.low %v3516_v40, %v3518_v1  ;;  %v3631_v3 = vrot.slane %v5518_v45, %v6519_v19 }
 0xe25   :  { %v3653_v61 = vrot.slane %v3638_v52, %v6519_v19 }
 0xe26   :  { %v3769_v55 = vcombine.low %v3520_v47, %v3535_v44  ;;  %v3639_v56 = vcombine.low %v3624_v32, %v3631_v3  ;;  %v3776_v58 = vrot.slane %v3768_v48, %v6519_v19 }
 0xe28   :  { %v3783_v29 = vrot.slane %v3769_v55, %v6519_v19  ;;  %v3646_v22 = vrot.slane %v3639_v56, %v6519_v19 }
 0xe2a   :  { %v3791_v53 = vcombine.low %v3776_v58, %v3783_v29  ;;  %v6874_v63 = vcombine.low %v3646_v22, %v3653_v61 }
 0xe2c   :  { %v3798_v27 = vrot.slane %v3791_v53, %v6519_v19  ;;  %5979 = vmatmul.mubr.msk.f32.vlgmr.msra.gmra.mxu1 %vm1230_vm3, %v6874_v63 }
 0xe2d   :  { %5982 = vmatpush3.xpose.msk.msra.mxu1 %vm1230_vm3, %v6876_v2  ;;  %5983 = vmatprep.mubr.msk.f32.mxu1 %vm6313_vm2, %v6312_v11 }
 0xe2e   :  { %v6886_v6 = vcombine.low %v3798_v27, %v3805_v4  ;;  %5991 = vmatprep.subr.mxu1 %v6312_v11 }
 0xe30   :  { %5984 = vmatmul.mubr.msk.f32.vlgmr.msra.gmra.mxu1 %vm1230_vm3, %v6886_v6 }
 0xe31   :  { %5993 = vmatprep.mubr.msk.f32.mxu1 %vm6313_vm2, %v6312_v11 }
 0xeec   :  { %v3764_v7 = vpop.f32.mrf.mxu1 }
 0xeed   :  { %v3920_v8 = vmul.f32 0.35355338, %v3764_v7 }
 0xeee   :  { %v5980_v41 = vpop.f32.mrf.mxu1 }
 0xeef   :  { %v3922_v9 = vsel %vm1459_vm4, %v3920_v8, -inf }
 0xef0   :  { %3923 = vmax.xlane.f32.xlu1 %v3922_v9  ;;  %v3916_v10 = vpop.f32.mrf.mxu1 }
 0xef1   :  { %v3921_v12 = vmul.f32 0.35355338, %v3916_v10 }
 0xef2   :  { %v5985_v30 = vpop.f32.mrf.mxu1 }
 0xef3   :  { %v3925_v13 = vsel %vm1459_vm4, %v3921_v12, -inf }
 0xef4   :  { %3926 = vmax.xlane.f32.xlu0 %v3925_v13 }
 0xf01   :  { %3944 = vrot.lane.b32.xlu1 %v6839_v5, %s6315_s13 }
 0xf79   :  { %v3924_v21 = vpop.xlane.xlu1 %3923 }
 0xf7a   :  { %v3928_v14 = vsub.f32 %v3920_v8, %v3924_v21 }
 0xf7c   :  { %v3930_v28 = vmul.f32 1.442695, %v3928_v14 }
 0xf7d   :  { %v3945_v36 = vpop.permute.xlu1 %3944  ;;  %v3927_v15 = vpop.xlane.xlu0 %3926 }
 0xf7e   :  { %6136 = vpow2.f32 %v3930_v28  ;;  %v3929_v17 = vsub.f32 %v3921_v12, %v3927_v15  ;;  %5987 = vmatpush3.msk.msra.mxu0 %vm1488_vm5, %v3945_v36 }
 0xf7f   :  { %5996 = vmatprep.subr.mxu0 %v6312_v11 }
 0xf80   :  { %v3932_v18 = vmul.f32 1.442695, %v3929_v17 }
 0xf82   :  { %6138 = vpow2.f32 %v3932_v18 }
 0xf8b   :  { %v6137_v23 = vpop.eup %6136 }
 0xf8c   :  { %v3934_v24 = vsel %vm1459_vm4, %v6137_v23, 0.0 }
 0xf8d   :  { %3935 = vadd.xlane.f32.xlu1 %v3934_v24 }
 0xf8f   :  { %v6139_v49 = vpop.eup %6138 }
 0xf90   :  { %v3937_v33 = vsel %vm1459_vm4, %v6139_v49, 0.0 }
 0xf91   :  { %3938 = vadd.xlane.f32.xlu0 %v3937_v33 }
 0xf9e   :  { %4100 = vrot.lane.b32.xlu1 %v6839_v5, %s6316_s8 }
 0xfa2   :  { %4178 = vrot.lane.b32.xlu1 %v6876_v2, %s6316_s8 }
 0xfa6   :  { %4176 = vrot.lane.b32.xlu1 %v6886_v6, %s6316_s8 }
 0xfa7   :  { %4021 = vrot.lane.b32.xlu0 %v6876_v2, %s6315_s13 }
 0xfab   :  { %4098 = vrot.lane.b32.xlu0 %v6874_v63, %s6316_s8  ;;  %s6324_s8 = smov [#allocation11]  }
0x1016   :  { %v3936_v25 = vpop.xlane.xlu1 %3935 }
0x1017   :  { %6140 = vrcp.f32 %v3936_v25 }
0x101a   :  { %v3939_v26 = vpop.xlane.xlu0 %3938  ;;  %v4101_v31 = vpop.permute.xlu1 %4100 }
0x101b   :  { %6142 = vrcp.f32 %v3939_v26 }
0x101e   :  { %v4022_v16 = vpop.permute.xlu0 %4021  ;;  %v4179_v51 = vpop.permute.xlu1 %4178 }
0x101f   :  { %5992 = vmatpush3.msk.msra.mxu1 %vm1488_vm5, %v4022_v16 }
0x1020   :  { %6001 = vmatprep.subr.mxu1 %v6312_v11 }
0x1022   :  { %v4099_v38 = vpop.permute.xlu0 %4098  ;;  %v4177_v59 = vpop.permute.xlu1 %4176 }
0x1024   :  { %v6141_v34 = vpop.eup %6140 }
0x1025   :  { %v3942_v35 = vmul.f32 %v6141_v34, %v6137_v23 }
0x1027   :  { %5989 = vmatmul.mubr.msk.f32.vlgmr.msra.gmra.mxu0 %vm1484_vm6, %v3942_v35 }
0x1028   :  { %v6143_v37 = vpop.eup %6142  ;;  %5997 = vmatpush3.xpose.msk.msra.mxu0 %vm1230_vm3, %v4101_v31  ;;  %5998 = vmatprep.mubr.msk.f32.mxu0 %vm6313_vm2, %v6312_v11 }
0x1029   :  { %v3943_v60 = vmul.f32 %v6143_v37, %v6139_v49  ;;  %6006 = vmatprep.subr.mxu0 %v6312_v11 }
0x102b   :  { %5994 = vmatmul.mubr.msk.f32.vlgmr.msra.gmra.mxu1 %vm1484_vm6, %v3943_v60  ;;  %5999 = vmatmul.mubr.msk.f32.vlgmr.msra.gmra.mxu0 %vm1230_vm3, %v4099_v38 }
0x102c   :  { %6002 = vmatpush3.xpose.msk.msra.mxu1 %vm1230_vm3, %v4179_v51  ;;  %6003 = vmatprep.mubr.msk.f32.mxu1 %vm6313_vm2, %v6312_v11 }
0x102d   :  { %6011 = vmatprep.subr.mxu1 %v6312_v11  ;;  %6008 = vmatprep.mubr.msk.f32.mxu0 %vm6313_vm2, %v6312_v11 }
0x102f   :  { %6004 = vmatmul.mubr.msk.f32.vlgmr.msra.gmra.mxu1 %vm1230_vm3, %v4177_v59 }
0x1030   :  { %6013 = vmatprep.mubr.msk.f32.mxu1 %vm6313_vm2, %v6312_v11 }
0x10e7   :  { %v6929_v39 = vpop.f32.mrf.mxu0 }
0x10e9   :  { %v5990_v40 = vpop.f32.mrf.mxu0 }
0x10eb   :  { %v6931_v1 = vpop.f32.mrf.mxu1  ;;  %v4172_v42 = vpop.f32.mrf.mxu0 }
0x10ec   :  { %v4254_v43 = vmul.f32 0.35355338, %v4172_v42 }
0x10ed   :  { %v5995_v44 = vpop.f32.mrf.mxu1  ;;  %v6000_v45 = vpop.f32.mrf.mxu0 }
0x10ee   :  { %v4256_v46 = vsel %vm1459_vm4, %v4254_v43, -inf }
0x10ef   :  { %4257 = vmax.xlane.f32.xlu0 %v4256_v46  ;;  %v4250_v47 = vpop.f32.mrf.mxu1 }
0x10f0   :  { %v4255_v32 = vmul.f32 0.35355338, %v4250_v47 }
0x10f1   :  { %v6005_v48 = vpop.f32.mrf.mxu1 }
0x10f2   :  { %v4259_v3 = vsel %vm1459_vm4, %v4255_v32, -inf }
0x10f3   :  { %4260 = vmax.xlane.f32.xlu1 %v4259_v3 }
0x1104   :  { %4278 = vrot.lane.b32.xlu1 %v6839_v5, %s6317_s14 }
0x1108   :  { %4434 = vrot.lane.b32.xlu1 %v6839_v5, %s6318_s15 }
0x110c   :  { %4512 = vrot.lane.b32.xlu1 %v6876_v2, %s6318_s15 }
0x1110   :  { %4510 = vrot.lane.b32.xlu1 %v6886_v6, %s6318_s15 }
0x1178   :  { %v4258_v52 = vpop.xlane.xlu0 %4257 }
0x1179   :  { %v4262_v54 = vsub.f32 %v4254_v43, %v4258_v52 }
0x117b   :  { %v4264_v55 = vmul.f32 1.442695, %v4262_v54 }
0x117c   :  { %v4261_v56 = vpop.xlane.xlu1 %4260 }
0x117d   :  { %6144 = vpow2.f32 %v4264_v55  ;;  %v4263_v57 = vsub.f32 %v4255_v32, %v4261_v56 }
0x117f   :  { %v4266_v20 = vmul.f32 1.442695, %v4263_v57 }
0x1180   :  { %v4279_v58 = vpop.permute.xlu1 %4278 }
0x1181   :  { %6146 = vpow2.f32 %v4266_v20  ;;  %6007 = vmatpush3.msk.msra.mxu0 %vm1488_vm5, %v4279_v58 }
0x1182   :  { %6016 = vmatprep.subr.mxu0 %v6312_v11 }
0x1184   :  { %v4435_v7 = vpop.permute.xlu1 %4434 }
0x1188   :  { %v4513_v10 = vpop.permute.xlu1 %4512 }
0x118a   :  { %v6145_v29 = vpop.eup %6144 }
0x118b   :  { %v4268_v61 = vsel %vm1459_vm4, %v6145_v29, 0.0 }
0x118c   :  { %4269 = vadd.xlane.f32.xlu0 %v4268_v61  ;;  %v4511_v13 = vpop.permute.xlu1 %4510 }
0x118e   :  { %v6147_v22 = vpop.eup %6146 }
0x118f   :  { %v4271_v50 = vsel %vm1459_vm4, %v6147_v22, 0.0 }
0x1190   :  { %4272 = vadd.xlane.f32.xlu0 %v4271_v50 }
0x11a6   :  { %4355 = vrot.lane.b32.xlu0 %v6876_v2, %s6317_s14  ;;  %s5421_s14 = sshll.u32 %s6324_s8, 4  ;;  %s5422_s14 = int_to_ptr.vmem [resolvable:$true] %s5421_s14 }
0x11a7   :  { %p6277_p12 = scmp.lt.s32.totalorder %s5422_s14, %s5422_s14 }
0x11aa   :  { %4432 = vrot.lane.b32.xlu0 %v6874_v63, %s6318_s15  ;;  %s6272_s15 = scalar_lea.vmem %s5422_s14, 256 }
0x11ab   :  { %p6273_p11 = scmp.ne.s32.totalorder %s5422_s14, %s6272_s15  ;;  %p6278_p13 = scmp.lt.s32.totalorder %s6272_s15, %s6272_s15 }
0x11ad   :  { %p6279_p0 = por %p6278_p13, %p6277_p12 }
0x11af   :  { %p6280_p1 = pnand %p6279_p0, %p6273_p11 }
0x1215   :  { %v4270_v53 = vpop.xlane.xlu0 %4269 }
0x1216   :  { %6148 = vrcp.f32 %v4270_v53 }
0x1219   :  { %v4273_v4 = vpop.xlane.xlu0 %4272 }
0x121a   :  { %6150 = vrcp.f32 %v4273_v4 }
0x121d   :  { %v4356_v27 = vpop.permute.xlu0 %4355 }
0x121e   :  { %6012 = vmatpush3.msk.msra.mxu1 %vm1488_vm5, %v4356_v27 }
0x121f   :  { %6021 = vmatprep.subr.mxu1 %v6312_v11 }
0x1221   :  { %v4433_v30 = vpop.permute.xlu0 %4432 }
0x1223   :  { %v6149_v8 = vpop.eup %6148 }
0x1224   :  { %v4276_v41 = vmul.f32 %v6149_v8, %v6145_v29 }
0x1226   :  { %6009 = vmatmul.mubr.msk.f32.vlgmr.msra.gmra.mxu0 %vm1484_vm6, %v4276_v41 }
0x1227   :  { %v6151_v9 = vpop.eup %6150  ;;  %6017 = vmatpush3.xpose.msk.msra.mxu0 %vm1230_vm3, %v4435_v7  ;;  %6018 = vmatprep.mubr.msk.f32.mxu0 %vm6313_vm2, %v6312_v11 }
0x1228   :  { %v4277_v12 = vmul.f32 %v6151_v9, %v6147_v22  ;;  %6026 = vmatprep.subr.mxu0 %v6312_v11 }
0x122a   :  { %6014 = vmatmul.mubr.msk.f32.vlgmr.msra.gmra.mxu1 %vm1484_vm6, %v4277_v12  ;;  %6019 = vmatmul.mubr.msk.f32.vlgmr.msra.gmra.mxu0 %vm1230_vm3, %v4433_v30 }
0x122b   :  { %6022 = vmatpush3.xpose.msk.msra.mxu1 %vm1230_vm3, %v4513_v10  ;;  %6023 = vmatprep.mubr.msk.f32.mxu1 %vm6313_vm2, %v6312_v11 }
0x122c   :  { %6031 = vmatprep.subr.mxu1 %v6312_v11  ;;  %6028 = vmatprep.mubr.msk.f32.mxu0 %vm6313_vm2, %v6312_v11 }
0x122e   :  { %6024 = vmatmul.mubr.msk.f32.vlgmr.msra.gmra.mxu1 %vm1230_vm3, %v4511_v13 }
0x122f   :  { %6033 = vmatprep.mubr.msk.f32.mxu1 %vm6313_vm2, %v6312_v11 }
0x12e6   :  { %v6969_v21 = vpop.f32.mrf.mxu0 }
0x12e8   :  { %v6010_v14 = vpop.f32.mrf.mxu0 }
0x12ea   :  { %v6971_v28 = vpop.f32.mrf.mxu1  ;;  %v4506_v36 = vpop.f32.mrf.mxu0 }
0x12eb   :  { %v4588_v15 = vmul.f32 0.35355338, %v4506_v36 }
0x12ec   :  { %v6015_v17 = vpop.f32.mrf.mxu1  ;;  %v6020_v18 = vpop.f32.mrf.mxu0 }
0x12ed   :  { %v4590_v23 = vsel %vm1459_vm4, %v4588_v15, -inf }
0x12ee   :  { %4591 = vmax.xlane.f32.xlu0 %v4590_v23  ;;  %v4584_v24 = vpop.f32.mrf.mxu1  ;;  %v5214_v23 = vld [vmem:[#allocation10 + $0x38] sm:$0xff] }
0x12ef   :  { %v4589_v49 = vmul.f32 0.35355338, %v4584_v24 }
0x12f0   :  { %v6025_v33 = vpop.f32.mrf.mxu1 }
0x12f1   :  { %v4593_v25 = vsel %vm1459_vm4, %v4589_v49, -inf  ;;  %v5212_v33 = vld [vmem:[#allocation10 + $0x28] sm:$0xff] }
0x12f2   :  { %4594 = vmax.xlane.f32.xlu1 %v4593_v25 }
0x1303   :  { %4612 = vrot.lane.b32.xlu1 %v6839_v5, %s6319_s16 }
0x1307   :  { %4768 = vrot.lane.b32.xlu1 %v6839_v5, %s6320_s17 }
0x130b   :  { %4846 = vrot.lane.b32.xlu1 %v6876_v2, %s6320_s17 }
0x130f   :  { %4844 = vrot.lane.b32.xlu1 %v6886_v6, %s6320_s17 }
0x1377   :  { %v4592_v26 = vpop.xlane.xlu0 %4591 }
0x1378   :  { %v4596_v16 = vsub.f32 %v4588_v15, %v4592_v26  ;;  %v5211_v26 = vld [vmem:[#allocation10 + $0x20] sm:$0xff] }
0x137a   :  { %v4598_v31 = vmul.f32 1.442695, %v4596_v16 }
0x137b   :  { %v4595_v34 = vpop.xlane.xlu1 %4594 }
0x137c   :  { %6152 = vpow2.f32 %v4598_v31  ;;  %v4597_v35 = vsub.f32 %v4589_v49, %v4595_v34  ;;  %v5213_v49 = vld [vmem:[#allocation10 + $0x30] sm:$0xff] }
0x137e   :  { %v4600_v37 = vmul.f32 1.442695, %v4597_v35 }
0x137f   :  { %v4613_v51 = vpop.permute.xlu1 %4612 }
0x1380   :  { %6154 = vpow2.f32 %v4600_v37  ;;  %6027 = vmatpush3.msk.msra.mxu0 %vm1488_vm5, %v4613_v51 }
0x1381   :  { %6036 = vmatprep.subr.mxu0 %v6312_v11 }
0x1383   :  { %v4769_v44 = vpop.permute.xlu1 %4768 }
0x1387   :  { %v4847_v32 = vpop.permute.xlu1 %4846 }
0x1389   :  { %v6153_v60 = vpop.eup %6152 }
0x138a   :  { %v4602_v38 = vsel %vm1459_vm4, %v6153_v60, 0.0 }
0x138b   :  { %4603 = vadd.xlane.f32.xlu0 %v4602_v38  ;;  %v4845_v3 = vpop.permute.xlu1 %4844 }
0x138d   :  { %v6155_v59 = vpop.eup %6154 }
0x138e   :  { %v4605_v6 = vsel %vm1459_vm4, %v6155_v59, 0.0 }
0x138f   :  { %4606 = vadd.xlane.f32.xlu0 %v4605_v6 }
0x13a5   :  { %4689 = vrot.lane.b32.xlu0 %v6876_v2, %s6319_s16 }
0x13a9   :  { %4766 = vrot.lane.b32.xlu0 %v6874_v63, %s6320_s17 }
0x1414   :  { %v4604_v40 = vpop.xlane.xlu0 %4603 }
0x1415   :  { %6156 = vrcp.f32 %v4604_v40 }
0x1418   :  { %v4607_v42 = vpop.xlane.xlu0 %4606 }
0x1419   :  { %6158 = vrcp.f32 %v4607_v42 }
0x141c   :  { %v4690_v43 = vpop.permute.xlu0 %4689 }
0x141d   :  { %6032 = vmatpush3.msk.msra.mxu1 %vm1488_vm5, %v4690_v43 }
0x141e   :  { %6041 = vmatprep.subr.mxu1 %v6312_v11 }
0x1420   :  { %v4767_v48 = vpop.permute.xlu0 %4766 }
0x1422   :  { %v6157_v45 = vpop.eup %6156 }
0x1423   :  { %v4610_v46 = vmul.f32 %v6157_v45, %v6153_v60 }
0x1425   :  { %6029 = vmatmul.mubr.msk.f32.vlgmr.msra.gmra.mxu0 %vm1484_vm6, %v4610_v46 }
0x1426   :  { %v6159_v47 = vpop.eup %6158  ;;  %6037 = vmatpush3.xpose.msk.msra.mxu0 %vm1230_vm3, %v4769_v44  ;;  %6038 = vmatprep.mubr.msk.f32.mxu0 %vm6313_vm2, %v6312_v11 }
0x1427   :  { %v4611_v63 = vmul.f32 %v6159_v47, %v6155_v59  ;;  %6046 = vmatprep.subr.mxu0 %v6312_v11 }
0x1429   :  { %6034 = vmatmul.mubr.msk.f32.vlgmr.msra.gmra.mxu1 %vm1484_vm6, %v4611_v63  ;;  %6039 = vmatmul.mubr.msk.f32.vlgmr.msra.gmra.mxu0 %vm1230_vm3, %v4767_v48 }
0x142a   :  { %6042 = vmatpush3.xpose.msk.msra.mxu1 %vm1230_vm3, %v4847_v32  ;;  %6043 = vmatprep.mubr.msk.f32.mxu1 %vm6313_vm2, %v6312_v11 }
0x142b   :  { %6051 = vmatprep.subr.mxu1 %v6312_v11  ;;  %6048 = vmatprep.mubr.msk.f32.mxu0 %vm6313_vm2, %v6312_v11 }
0x142d   :  { %6044 = vmatmul.mubr.msk.f32.vlgmr.msra.gmra.mxu1 %vm1230_vm3, %v4845_v3 }
0x142e   :  { %6053 = vmatprep.mubr.msk.f32.mxu1 %vm6313_vm2, %v6312_v11 }
0x14e5   :  { %v4685_v52 = vpop.f32.mrf.mxu0 }
0x14e7   :  { %v6030_v54 = vpop.f32.mrf.mxu0 }
0x14e9   :  { %v4762_v55 = vpop.f32.mrf.mxu1  ;;  %v4840_v56 = vpop.f32.mrf.mxu0 }
0x14ea   :  { %v4922_v57 = vmul.f32 0.35355338, %v4840_v56 }
0x14eb   :  { %v6035_v20 = vpop.f32.mrf.mxu1  ;;  %v6040_v58 = vpop.f32.mrf.mxu0 }
0x14ec   :  { %v4924_v29 = vsel %vm1459_vm4, %v4922_v57, -inf }
0x14ed   :  { %4925 = vmax.xlane.f32.xlu0 %v4924_v29  ;;  %v4918_v61 = vpop.f32.mrf.mxu1 }
0x14ee   :  { %v4923_v22 = vmul.f32 0.35355338, %v4918_v61 }
0x14ef   :  { %v6045_v50 = vpop.f32.mrf.mxu1 }
0x14f0   :  { %v4927_v53 = vsel %vm1459_vm4, %v4923_v22, -inf }
0x14f1   :  { %4928 = vmax.xlane.f32.xlu1 %v4927_v53 }
0x1502   :  { %4946 = vrot.lane.b32.xlu1 %v6839_v5, %s6321_s18 }
0x1506   :  { %5102 = vrot.lane.b32.xlu1 %v6969_v21, %s6303_s27 }
0x150a   :  { %5104 = vrot.lane.b32.xlu1 %v6971_v28, %s6303_s27 }
0x150e   :  { %5112 = vrot.lane.b32.xlu1 %v4762_v55, %s6322_s3 }
0x1576   :  { %v4926_v11 = vpop.xlane.xlu0 %4925 }
0x1577   :  { %v4930_v4 = vsub.f32 %v4922_v57, %v4926_v11 }
0x1579   :  { %v4932_v27 = vmul.f32 1.442695, %v4930_v4 }
0x157a   :  { %v4929_v7 = vpop.xlane.xlu1 %4928 }
0x157b   :  { %6160 = vpow2.f32 %v4932_v27  ;;  %v4931_v8 = vsub.f32 %v4923_v22, %v4929_v7 }
0x157d   :  { %v4934_v41 = vmul.f32 1.442695, %v4931_v8 }
0x157e   :  { %v4947_v9 = vpop.permute.xlu1 %4946 }
0x157f   :  { %6162 = vpow2.f32 %v4934_v41  ;;  %6047 = vmatpush3.msk.msra.mxu0 %vm1488_vm5, %v4947_v9 }
0x1580   :  { %6056 = vmatprep.subr.mxu0 %v5214_v23 }
0x1582   :  { %v5103_v16 = vpop.permute.xlu1 %5102 }
0x1583   :  { %v5124_v35 = vsel %vm1230_vm3, %v6929_v39, %v5103_v16 }
0x1586   :  { %v5105_v31 = vpop.permute.xlu1 %5104 }
0x1587   :  { %v5125_v40 = vsel %vm1230_vm3, %v6931_v1, %v5105_v31 }
0x1588   :  { %v6161_v5 = vpop.eup %6160 }
0x1589   :  { %v4936_v10 = vsel %vm1459_vm4, %v6161_v5, 0.0 }
0x158a   :  { %4937 = vadd.xlane.f32.xlu0 %v4936_v10  ;;  %v5113_v37 = vpop.permute.xlu1 %5112 }
0x158b   :  { %v5127_v42 = vsel %vm118_vm0, %v5125_v40, %v5113_v37 }
0x158c   :  { %v6163_v12 = vpop.eup %6162 }
0x158d   :  { %v4939_v30 = vsel %vm1459_vm4, %v6163_v12, 0.0 }
0x158e   :  { %4940 = vadd.xlane.f32.xlu0 %v4939_v30 }
0x15a4   :  { %5023 = vrot.lane.b32.xlu0 %v6876_v2, %s6321_s18 }
0x15a8   :  { %5110 = vrot.lane.b32.xlu0 %v4685_v52, %s6322_s3 }
0x1613   :  { %v4938_v13 = vpop.xlane.xlu0 %4937 }
0x1614   :  { %6164 = vrcp.f32 %v4938_v13 }
0x1617   :  { %v4941_v21 = vpop.xlane.xlu0 %4940 }
0x1618   :  { %6166 = vrcp.f32 %v4941_v21 }
0x161b   :  { %v5024_v14 = vpop.permute.xlu0 %5023 }
0x161c   :  { %6052 = vmatpush3.msk.msra.mxu1 %vm1488_vm5, %v5024_v14 }
0x161f   :  { %v5111_v34 = vpop.permute.xlu0 %5110 }
0x1620   :  { %v5126_v51 = vsel %vm118_vm0, %v5124_v35, %v5111_v34 }
0x1621   :  { %v6165_v28 = vpop.eup %6164 }
0x1622   :  { %v4944_v36 = vmul.f32 %v6165_v28, %v6161_v5 }
0x1624   :  { %6049 = vmatmul.mubr.msk.f32.vlgmr.msra.gmra.mxu0 %vm1484_vm6, %v4944_v36 }
0x1625   :  { %v6167_v15 = vpop.eup %6166  ;;  %6057 = vmatpush3.msra.mxu0 %v5214_v23 }
0x1626   :  { %v4945_v17 = vmul.f32 %v6167_v15, %v6163_v12  ;;  %6058 = vmatprep.subr.mxu0 %v5213_v49  ;;  %v5553_v12 = vld [vmem:[%s7089_s9 + $0x1] ss:$0 sm:$0xff] }
0x1627   :  { %6059 = vmatpush3.msra.mxu0 %v5213_v49 }
0x1628   :  { %6054 = vmatmul.mubr.msk.f32.vlgmr.msra.gmra.mxu1 %vm1484_vm6, %v4945_v17  ;;  %6060 = vmatprep.subr.mxu0 %v5212_v33 }
0x1629   :  { %6061 = vmatpush3.msra.mxu0 %v5212_v33 }
0x162a   :  { %6062 = vmatprep.subr.mxu0 %v5211_v26 }
0x162b   :  { %6063 = vmatpush3.msra.mxu0 %v5211_v26 }
0x16e4   :  { %v5019_v18 = vpop.f32.mrf.mxu0 }
0x16e5   :  { %5118 = vrot.lane.b32.xlu0 %v5019_v18, %s6323_s19 }
0x16e6   :  { %v6050_v2 = vpop.f32.mrf.mxu0 }
0x16e8   :  { %v5096_v24 = vpop.f32.mrf.mxu1 }
0x16e9   :  { %5120 = vrot.lane.b32.xlu1 %v5096_v24, %s6323_s19 }
0x16ea   :  { %v6055_v25 = vpop.f32.mrf.mxu1 }
0x1757   :  { %v5119_v60 = vpop.permute.xlu0 %5118 }
0x1758   :  { %v5128_v38 = vsel %vm2668_vm7, %v5126_v51, %v5119_v60  ;;  %v5558_v60 = vld [vmem:[%s7090_s10 + $0x1] ss:$0 sm:$0xff] }
0x1759   :  { %v5132_v59 = vcombine.high %v5128_v38, %v5128_v38  ;;  %v5139_v6 = vrot.slane %v5128_v38, %v6519_v19 }
0x175b   :  { %v5147_v43 = vcombine.high %v5139_v6, %v5139_v6  ;;  %v5121_v44 = vpop.permute.xlu1 %5120  ;;  %v5146_v45 = vrot.slane %v5132_v59, %v6519_v19  ;;  %v5154_v46 = vrot.slane %v5139_v6, %v6519_v19  ;;  %v5560_v59 = vld [vmem:[%s7091_s11 + $0x1] ss:$0 sm:$0xff] }
0x175c   :  { %v5129_v39 = vsel %vm2668_vm7, %v5127_v42, %v5121_v44 }
0x175d   :  { %v5168_v47 = vrot.slane %v5147_v43, %v6519_v19  ;;  %v5171_v32 = vcombine.high %v5129_v39, %v5129_v39  ;;  %v5178_v63 = vrot.slane %v5129_v39, %v6519_v19  ;;  %v5161_v54 = vrot.slane %v5146_v45, %v6519_v19 }
0x175f   :  { %v5223_v48 = vcombine.low %v5154_v46, %v5168_v47  ;;  %v5554_v3 = vcombine.high %v5154_v46, %v5168_v47  ;;  %v5185_v52 = vrot.slane %v5171_v32, %v6519_v19  ;;  %v5186_v1 = vcombine.high %v5178_v63, %v5178_v63 }
0x1760   :  { %v5193_v55 = vrot.slane %v5178_v63, %v6519_v19 }
0x1761   :  { %v5207_v56 = vrot.slane %v5186_v1, %v6519_v19  ;;  %v5233_v57 = vrot.slane %v5223_v48, %v6519_v19  ;;  %v5240_v20 = vrot.slane %v5554_v3, %v6519_v19  ;;  %v5200_v61 = vrot.slane %v5185_v52, %v6519_v19 }
0x1762   :  { %v5208_v58 = vcombine.high %v5193_v55, %v5193_v55  ;;  %v5225_v29 = vcombine.low %v5161_v54, %v5193_v55 }
0x1763   :  { %v5209_v22 = vcombine.high %v5207_v56, %v5207_v56  ;;  %v5255_v11 = vcombine.low %v5233_v57, %v5240_v20 }
0x1764   :  { %v5226_v50 = vcombine.low %v5207_v56, %v5208_v58  ;;  %v5247_v4 = vrot.slane %v5225_v29, %v6519_v19 }
0x1765   :  { %v5272_v53 = vcombine.low %v5209_v22, %v5200_v61  ;;  %v5263_v41 = vrot.slane %v5255_v11, %v6519_v19 }
0x1766   :  { %v5254_v27 = vrot.slane %v5226_v50, %v6519_v19 }
0x1767   :  { %v5279_v8 = vrot.slane %v5272_v53, %v6519_v19 }
0x1768   :  { %v5256_v7 = vcombine.low %v5247_v4, %v5254_v27 }
0x1769   :  { %v5286_v10 = vrot.slane %v5279_v8, %v6519_v19 }
0x176a   :  { %v5270_v9 = vrot.slane %v5256_v7, %v6519_v19 }
0x176c   :  { %v5271_v5 = vcombine.low %v5263_v41, %v5270_v9 }
0x176e   :  { %6064 = vmatprep.mubr.msk.f32.mxu0 %vm495_vm1, %v5271_v5 }
0x176f   :  { %6065 = vmatmul.mubr.msk.f32.vlgmr.msra.gmra.mxu0 %vm495_vm1, %v5286_v10 }
0x182f   :  { %v6066_v30 = vpop.f32.mrf.mxu0 }
0x1830   :  { %v5363_v13 = vadd.f32 %v6066_v30, %v5553_v12 }
0x1831   :  { %v5357_v21 = vpop.f32.mrf.mxu0 }
0x1832   :  { %v5367_v14 = vadd.f32 %v5363_v13, %v6786_v0  ;;  %v5358_v28 = vadd.f32 %v5553_v12, %v5357_v21 }
0x1834   :  { %v5371_v36 = vsel %vm2910_vm8, %v5367_v14, 0.0  ;;  %v5366_v15 = vadd.f32 %v5358_v28, %v6780_v62 }
0x1835   :  { %5372 = vadd.xlane.f32.xlu1 %v5371_v36 }
0x1836   :  { %v5368_v19 = vsel %vm495_vm1, %v5366_v15, 0.0 }
0x1837   :  { %5369 = vadd.xlane.f32.xlu0 %v5368_v19 }
0x18be   :  { %v5373_v17 = vpop.xlane.xlu1 %5372 }
0x18bf   :  { %v5375_v18 = vmul.f32 0.03125, %v5373_v17 }
0x18c0   :  { %v5370_v2 = vpop.xlane.xlu0 %5369 }
0x18c1   :  { %v5374_v23 = vmul.f32 0.03125, %v5370_v2  ;;  %v5377_v24 = vsub.f32 %v5367_v14, %v5375_v18 }
0x18c3   :  { %v5376_v49 = vsub.f32 %v5366_v15, %v5374_v23  ;;  %v5379_v26 = vmul.f32 %v5377_v24, %v5377_v24 }
0x18c5   :  { %v5378_v33 = vmul.f32 %v5376_v49, %v5376_v49  ;;  %v5383_v0 = vsel %vm2910_vm8, %v5379_v26, 0.0 }
0x18c7   :  { %v5380_v25 = vsel %vm495_vm1, %v5378_v33, 0.0 }
0x18c8   :  { %5381 = vadd.xlane.f32.xlu0 %v5380_v25 }
0x18cc   :  { %5384 = vadd.xlane.f32.xlu0 %v5383_v0 }
0x1951   :  { %v5382_v16 = vpop.xlane.xlu0 %5381 }
0x1952   :  { %v5386_v62 = vmul.f32 0.03125, %v5382_v16 }
0x1954   :  { %v5388_v31 = vadd.f32 1e-05, %v5386_v62 }
0x1955   :  { %v5385_v34 = vpop.xlane.xlu0 %5384 }
0x1956   :  { %6168 = vrsqrt.f32 %v5388_v31  ;;  %v5387_v35 = vmul.f32 0.03125, %v5385_v34 }
0x1958   :  { %v5389_v37 = vadd.f32 1e-05, %v5387_v35 }
0x195a   :  { %6170 = vrsqrt.f32 %v5389_v37 }
0x1963   :  { %v6169_v51 = vpop.eup %6168 }
0x1964   :  { %v5392_v38 = vmul.f32 %v6169_v51, %v5376_v49 }
0x1966   :  { %v5402_v6 = vmul.f32 %v5558_v60, %v5392_v38 }
0x1967   :  { %v6171_v40 = vpop.eup %6170 }
0x1968   :  { %v5393_v42 = vmul.f32 %v6171_v40, %v5377_v24  ;;  %v5412_v43 = vadd.f32 %v5560_v59, %v5402_v6 }
0x196a   :  { %v5403_v44 = vmul.f32 %v5558_v60, %v5393_v42  ;;  %5414 = vst.msk [vmem:[#allocation11] sm:$0xff] %vm495_vm1, %v5412_v43 }
0x196c   :  { %v5413_v45 = vadd.f32 %v5560_v59, %v5403_v44 }
0x196e   :  { %5415 = vst.msk [vmem:[#allocation11 + $0x8] sm:$0x3] %vm2910_vm8, %v5413_v45 }
0x196f   :  { %6283 = shalt.err (!%p6280_p1)
}
0x1970   :  { %5427 = dma.vmem_to_hbm [thread:$0]  %s5422_s14, 256, %s7092_s12, [#allocation4], %s6302_s26, %s6302_s26, %s6303_s27  }
0x1971   :  { %6298 = dma.done.wait [#allocation4], 256  }
0x1972   :  { %6299 = vsyncadd [#allocation4], 4294967040 }
0x1973   :  { %5431 = vsyncpa [#allocation3], 1 }
0x1974   :  { %5432 = vsyncpa [#allocation6], 1 }
0x1975   :  { %5433 = vsyncpa [#allocation9], 1 }
0x1976   :  { %5434 = vsyncpa [#allocation4], 1 }

</bundles_post_ra>
